<compile_context>
chip_gen: v7x
topology: tpu7x:2x2x1
jax: 0.10.0
libtpu: 0.0.40
codegen_flags: <defaults>
</compile_context>

<pallas_src>
import functools

import jax
import jax.numpy as jnp
from jax import lax
from jax.experimental import pallas as pl
from jax.experimental.pallas import tpu as pltpu


def _round_up(x, m):
    return (x + m - 1) // m * m


def lstm_fc_kernel(x_ref, wih_ref, whh_ref, b_ref, wfc_ref, bfc_ref, out_ref,
                   h_ref, c_ref, xp_ref, *, seq_len, time_padded, act_dtype):
    """One (batch-tile, time-chunk) grid step of the LSTM recurrence + final fc.

    x_ref:   (1, CT, BT, D) time-major input chunk (matmul dtype)
    wih_ref: (D, 4G)  W_ih^T, gate order (i, f, o, g), i/f/o columns pre-scaled by 0.5
    whh_ref: (G, 4G)  W_hh^T, same layout
    b_ref:   (1, 4G)  b_ih + b_hh (f32), same layout / scaling
    wfc_ref: (G, Op)  fc weight^T, padded
    bfc_ref: (1, Op)  fc bias (f32), padded
    out_ref: (BT, Op) f32 lane-dense output (wrapper slices back to (B, O))
    h_ref, c_ref: (BT, G) f32 VMEM scratch carrying the state across time chunks
    xp_ref:  (CT, BT, 4G) VMEM scratch holding the hoisted input projection of the chunk
    """
    t_blk = pl.program_id(1)
    _, ct, bt, _ = x_ref.shape
    g4 = whh_ref.shape[1]
    g = g4 // 4

    @pl.when(t_blk == 0)
    def _():
        h_ref[...] = jnp.zeros_like(h_ref)
        c_ref[...] = jnp.zeros_like(c_ref)

    # Hoisted input projection: one well-shaped MXU matmul per chunk (M = CT*BT), bias
    # folded in.  x arrives time-major, so the reshape below is layout-free.
    x2d = x_ref[...].reshape(ct * bt, x_ref.shape[-1])
    xp = jnp.dot(x2d, wih_ref[...], preferred_element_type=jnp.float32) + b_ref[...]
    xp_ref[...] = xp.reshape(ct, bt, g4).astype(xp_ref.dtype)

    whh = whh_ref[...]

    def step(t, carry):
        h, c = carry
        gates = xp_ref[t].astype(jnp.float32) + jnp.dot(
            h.astype(whh.dtype), whh, preferred_element_type=jnp.float32)   # (BT, 4G) f32
        # Transcendentals in act_dtype (bf16 on v6e/v7x); state update & carry stay f32.
        ga = gates.astype(act_dtype)
        # sigmoid(x) = 0.5*tanh(x/2) + 0.5; the 0.5 pre-scale is already folded into the
        # i/f/o weights+bias, so i/f/o cost one tanh each (single EUP op per element).
        sig = jnp.tanh(ga[:, :3 * g]).astype(jnp.float32) * 0.5 + 0.5       # i, f, o
        gg = jnp.tanh(ga[:, 3 * g:]).astype(jnp.float32)                    # g
        i_t = sig[:, :g]
        f_t = sig[:, g:2 * g]
        o_t = sig[:, 2 * g:3 * g]
        c_new = f_t * c + i_t * gg
        h_new = o_t * jnp.tanh(c_new.astype(act_dtype)).astype(jnp.float32)
        if time_padded:
            # Mask padded trailing time steps: zero-padded x still updates h/c through
            # the biases, so padded steps must be no-ops, not just zero-input steps.
            keep = (t_blk * ct + t < seq_len).astype(jnp.float32)
            h_new = keep * h_new + (1.0 - keep) * h
            c_new = keep * c_new + (1.0 - keep) * c
        return h_new, c_new

    h, c = lax.fori_loop(0, ct, step, (h_ref[...], c_ref[...]), unroll=True)
    h_ref[...] = h
    c_ref[...] = c

    @pl.when(t_blk == pl.num_programs(1) - 1)
    def _():
        out_ref[...] = (
            jnp.dot(h.astype(wfc_ref.dtype), wfc_ref[...],
                    preferred_element_type=jnp.float32) + bfc_ref[...]
        ).astype(out_ref.dtype)


def _prep_weights(w_ih, w_hh, b_ih, b_hh, w_fc, b_fc, H, G, Op, mm_dtype):
    """Gate reorder (i,f,g,o)->(i,f,o,g), transpose, lane-pad each gate to G, and fold
    the 0.5 sigmoid-as-tanh pre-scale into the i/f/o gates (padded lanes stay exactly 0)."""
    O = w_fc.shape[0]
    scales = (0.5, 0.5, 0.5, 1.0)          # i, f, o get the tanh-form pre-scale; g does not

    def gate_blocks(w):                    # torch order (i, f, g, o) -> (i, f, o, g)
        i, f, g, o = jnp.split(w, 4, axis=0)
        return [i, f, o, g]

    def pack(w):                           # (4H, X) -> (X, 4G)
        cols = [jnp.pad(s * blk.T, ((0, 0), (0, G - H)))
                for s, blk in zip(scales, gate_blocks(w))]
        return jnp.concatenate(cols, axis=1)

    wih_t = pack(w_ih)                                              # (D, 4G)
    whh_t = jnp.pad(pack(w_hh), ((0, G - H), (0, 0)))               # (G, 4G)

    b = b_ih + b_hh
    bias = jnp.concatenate([jnp.pad(s * blk, (0, G - H))
                            for s, blk in zip(scales, gate_blocks(b))])
    bias = bias.reshape(1, 4 * G).astype(jnp.float32)

    wfc_t = jnp.pad(w_fc.T, ((0, G - H), (0, Op - O)))              # (G, Op)
    bfc = jnp.pad(b_fc, (0, Op - O)).reshape(1, Op).astype(jnp.float32)

    return (wih_t.astype(mm_dtype), whh_t.astype(mm_dtype), bias,
            wfc_t.astype(mm_dtype), bfc)


def simple_lstm_forward(x, params, *, time_chunk=16, batch_tile=256,
                        matmul_dtype=jnp.bfloat16, act_dtype=jnp.bfloat16):
    """x: (B, T, D) batch-first, like the PyTorch module. Returns (B, O) f32.

    Defaults target v6e/v7x (256-row MXU, bf16 EUP).  On v5e prefer
    batch_tile=128 and act_dtype=jnp.float32 (no bf16 transcendentals there).
    """
    w_ih, w_hh = params["weight_ih"], params["weight_hh"]
    b_ih, b_hh = params["bias_ih"], params["bias_hh"]
    w_fc, b_fc = params["fc_weight"], params["fc_bias"]

    B, T, D = x.shape
    H = w_hh.shape[1]
    O = w_fc.shape[0]

    G = _round_up(H, 128)                  # per-gate lane width (whole-vreg gate math)
    Op = _round_up(O, 128)                 # lane-dense fc output

    # Batch tiling: >=2 chunks whenever the batch allows it, so both v7x TensorCores get
    # work on the "parallel" axis; capped at batch_tile.
    Bp0 = _round_up(B, 8)
    two_way = _round_up(-(-Bp0 // 2), 8)
    BT = max(8, min(_round_up(batch_tile, 8), two_way))
    Bp = _round_up(Bp0, BT)
    BC = Bp // BT

    # Time chunking: always stream a bounded chunk (no CT=T fallback); pad T up to a
    # multiple of CT and mask the padded steps inside the kernel.
    CT = max(1, min(time_chunk, T))
    Tp = _round_up(T, CT)
    TC = Tp // CT
    time_padded = Tp != T

    wih_t, whh_t, bias, wfc_t, bfc = _prep_weights(
        w_ih, w_hh, b_ih, b_hh, w_fc, b_fc, H, G, Op, matmul_dtype)

    # One-time HBM layout transform: time-major chunks (TC, CT, Bp, D), so the kernel
    # never transposes on the pipelined path.
    x_p = jnp.pad(x, ((0, Bp - B), (0, Tp - T), (0, 0)))
    x_tm = jnp.transpose(x_p, (1, 0, 2)).reshape(TC, CT, Bp, D).astype(matmul_dtype)

    # VMEM budget from actual (lane-padded) buffer sizes; x's minor dim D < 128 inflates
    # its resident footprint ~128/D x, which is accounted for here.
    mm_bytes = jnp.dtype(matmul_dtype).itemsize
    Dl = _round_up(D, 128)
    est_vmem = (
        2 * CT * BT * Dl * mm_bytes                      # x chunk (double buffered)
        + 2 * (D + G) * 4 * G * mm_bytes                 # wih + whh (double buffered)
        + 2 * G * Op * mm_bytes                          # wfc
        + 2 * (4 * G + Op) * 4                           # biases (f32)
        + 2 * BT * Op * 4                                # output block
        + 2 * BT * G * 4                                 # h, c carries
        + CT * BT * 4 * G * mm_bytes                     # xp scratch
    )
    vmem_limit = int(min(64 * 2 ** 20, max(32 * 2 ** 20, 2 * est_vmem)))

    kernel = functools.partial(lstm_fc_kernel, seq_len=T, time_padded=time_padded,
                               act_dtype=act_dtype)

    grid_spec = pltpu.PrefetchScalarGridSpec(
        num_scalar_prefetch=0,
        grid=(BC, TC),
        in_specs=[
            pl.BlockSpec((1, CT, BT, D), lambda b, t: (t, 0, b, 0)),   # streamed x chunk
            pl.BlockSpec((D, 4 * G), lambda b, t: (0, 0)),
            pl.BlockSpec((G, 4 * G), lambda b, t: (0, 0)),
            pl.BlockSpec((1, 4 * G), lambda b, t: (0, 0)),
            pl.BlockSpec((G, Op), lambda b, t: (0, 0)),
            pl.BlockSpec((1, Op), lambda b, t: (0, 0)),
        ],
        out_specs=pl.BlockSpec((BT, Op), lambda b, t: (b, 0)),
        scratch_shapes=[
            pltpu.VMEM((BT, G), jnp.float32),            # h carry
            pltpu.VMEM((BT, G), jnp.float32),            # c carry
            pltpu.VMEM((CT, BT, 4 * G), matmul_dtype),   # per-chunk input projection
        ],
    )

    out_padded = pl.pallas_call(
        kernel,
        out_shape=jax.ShapeDtypeStruct((Bp, Op), jnp.float32),
        grid_spec=grid_spec,
        compiler_params=pltpu.CompilerParams(
            dimension_semantics=("parallel", "arbitrary"),
            vmem_limit_bytes=vmem_limit),
    )(x_tm, wih_t, whh_t, bias, wfc_t, bfc)

    return out_padded[:B, :O]


def simple_lstm_reference(x, params):
    """Pure-JAX f32 reference matching torch.nn.LSTM(batch_first) + Linear semantics."""
    w_ih, w_hh, b_ih, b_hh, w_fc, b_fc = (
        params["weight_ih"], params["weight_hh"], params["bias_ih"],
        params["bias_hh"], params["fc_weight"], params["fc_bias"],
    )
    B = x.shape[0]
    H = w_hh.shape[1]

    def step(carry, x_t):
        h, c = carry
        gates = x_t @ w_ih.T + h @ w_hh.T + b_ih + b_hh
        i, f, g, o = jnp.split(gates, 4, axis=-1)
        c = jax.nn.sigmoid(f) * c + jax.nn.sigmoid(i) * jnp.tanh(g)
        h = jax.nn.sigmoid(o) * jnp.tanh(c)
        return (h, c), None

    h0 = jnp.zeros((B, H), jnp.float32)
    c0 = jnp.zeros((B, H), jnp.float32)
    (h_last, _), _ = lax.scan(step, (h0, c0), jnp.swapaxes(x, 0, 1))
    return h_last @ w_fc.T + b_fc


def init_params(key, input_dim, hidden_dim, output_dim):
    # Deterministic init mirroring PyTorch's uniform(-1/sqrt(H), 1/sqrt(H)).
    k = 1.0 / jnp.sqrt(jnp.float32(hidden_dim))
    keys = jax.random.split(key, 6)
    u = lambda kk, shape: jax.random.uniform(kk, shape, jnp.float32, -k, k)
    return {
        "weight_ih": u(keys[0], (4 * hidden_dim, input_dim)),
        "weight_hh": u(keys[1], (4 * hidden_dim, hidden_dim)),
        "bias_ih":   u(keys[2], (4 * hidden_dim,)),
        "bias_hh":   u(keys[3], (4 * hidden_dim,)),
        "fc_weight": u(keys[4], (output_dim, hidden_dim)),
        "fc_bias":   u(keys[5], (output_dim,)),
    }


if __name__ == "__main__":
    B, T, D, H, O = 2, 16, 16, 64, 3       # hidden_dim=64 matches the module default
    key = jax.random.PRNGKey(0)
    kx, kp = jax.random.split(key)
    x = jax.random.normal(kx, (B, T, D), jnp.float32)
    params = init_params(kp, D, H, O)

    ref = simple_lstm_reference(x, params)

    # f32 path (matmuls and transcendentals in f32): tight structural check vs reference.
    out_f32 = jax.block_until_ready(
        simple_lstm_forward(x, params, matmul_dtype=jnp.float32,
                            act_dtype=jnp.float32))
    assert out_f32.shape == (B, O)
    assert jnp.allclose(out_f32, ref, atol=2e-4, rtol=2e-4), (out_f32, ref)

    # Default perf path (bf16 matmuls + bf16 transcendentals, f32 state / accumulation).
    out = jax.block_until_ready(simple_lstm_forward(x, params))
    assert out.shape == (B, O)
    assert jnp.allclose(out, ref, atol=5e-2, rtol=5e-2), (out, ref)

    # Exercise the time-padding / in-kernel masking path (T not divisible by time_chunk).
    x_odd = x[:, :13]
    ref_odd = simple_lstm_reference(x_odd, params)
    out_odd = jax.block_until_ready(
        simple_lstm_forward(x_odd, params, time_chunk=8))
    assert jnp.allclose(out_odd, ref_odd, atol=5e-2, rtol=5e-2), (out_odd, ref_odd)

    print("KERNEL_OK")
</pallas_src>

<mosaic_0001>
module attributes {stable_mosaic.version = 11 : i64} {
  func.func @lstm_fc_kernel(%arg0: i32, %arg1: i32, %arg2: memref<1x16x8x16xf32, #tpu.memory_space<vmem>>, %arg3: memref<16x512xf32, #tpu.memory_space<vmem>>, %arg4: memref<128x512xf32, #tpu.memory_space<vmem>>, %arg5: memref<1x512xf32, #tpu.memory_space<vmem>>, %arg6: memref<128x128xf32, #tpu.memory_space<vmem>>, %arg7: memref<1x128xf32, #tpu.memory_space<vmem>>, %arg8: memref<8x128xf32, #tpu.memory_space<vmem>>, %arg9: memref<8x128xf32, #tpu.memory_space<vmem>>, %arg10: memref<8x128xf32, #tpu.memory_space<vmem>>, %arg11: memref<16x8x512xf32, #tpu.memory_space<vmem>>) attributes {dimension_semantics = [#tpu.dimension_semantics<parallel>, #tpu.dimension_semantics<arbitrary>], iteration_bounds = array<i64: 1, 1>, scalar_prefetch = 0 : i64, scratch_operands = 3 : i64, tpu.core_type = #tpu.core_type<tc>, window_params = [{transform_indices = @transform_0, window_bounds = array<i64: 1, 16, 8, 16>}, {pipeline_mode = #tpu.pipeline_mode<synchronous>, transform_indices = @transform_1, window_bounds = array<i64: 16, 512>}, {pipeline_mode = #tpu.pipeline_mode<synchronous>, transform_indices = @transform_2, window_bounds = array<i64: 128, 512>}, {pipeline_mode = #tpu.pipeline_mode<synchronous>, transform_indices = @transform_3, window_bounds = array<i64: 1, 512>}, {pipeline_mode = #tpu.pipeline_mode<synchronous>, transform_indices = @transform_4, window_bounds = array<i64: 128, 128>}, {pipeline_mode = #tpu.pipeline_mode<synchronous>, transform_indices = @transform_5, window_bounds = array<i64: 1, 128>}, {transform_indices = @transform_6, window_bounds = array<i64: 8, 128>}]} {
    %c0_i32 = arith.constant 0 : i32
    %0 = arith.cmpi eq, %arg1, %c0_i32 : i32
    %1 = arith.extui %0 : i1 to i32
    %c0_i32_0 = arith.constant 0 : i32
    %2 = arith.cmpi ne, %1, %c0_i32_0 : i32
    scf.if %2 {
      %cst_104 = arith.constant 0.000000e+00 : f32
      %356 = vector.broadcast %cst_104 : f32 to vector<8x128xf32>
      %c0_105 = arith.constant 0 : index
      %c0_106 = arith.constant 0 : index
      %357 = vector.load %arg9[%c0_105, %c0_106] : memref<8x128xf32, #tpu.memory_space<vmem>>, vector<8x128xf32>
      tpu.vector_store %arg9[%c0_105, %c0_106], %356 {strides = array<i32>} : memref<8x128xf32, #tpu.memory_space<vmem>>, vector<8x128xf32>,
      %cst_107 = arith.constant 0.000000e+00 : f32
      %358 = vector.broadcast %cst_107 : f32 to vector<8x128xf32>
      %c0_108 = arith.constant 0 : index
      %c0_109 = arith.constant 0 : index
      %359 = vector.load %arg10[%c0_108, %c0_109] : memref<8x128xf32, #tpu.memory_space<vmem>>, vector<8x128xf32>
      tpu.vector_store %arg10[%c0_108, %c0_109], %358 {strides = array<i32>} : memref<8x128xf32, #tpu.memory_space<vmem>>, vector<8x128xf32>,
    } else {
    }
    %c0 = arith.constant 0 : index
    %c0_1 = arith.constant 0 : index
    %c0_2 = arith.constant 0 : index
    %c0_3 = arith.constant 0 : index
    %3 = vector.load %arg2[%c0, %c0_1, %c0_2, %c0_3] : memref<1x16x8x16xf32, #tpu.memory_space<vmem>>, vector<1x16x8x16xf32>
    %4 = vector.shape_cast %3 : vector<1x16x8x16xf32> to vector<128x16xf32>
    %c0_4 = arith.constant 0 : index
    %c0_5 = arith.constant 0 : index
    %5 = vector.load %arg3[%c0_4, %c0_5] : memref<16x512xf32, #tpu.memory_space<vmem>>, vector<16x512xf32>
    %cst = arith.constant dense<0.000000e+00> : vector<128x512xf32>
    %6 = tpu.matmul %4, %5, %cst {dimension_numbers = #tpu.dot_dimension_numbers<[1], [0], [0], [1], [0, 0, 1, 1], [], []>} : vector<128x16xf32>, vector<16x512xf32>, vector<128x512xf32> -> vector<128x512xf32>
    %c0_6 = arith.constant 0 : index
    %c0_7 = arith.constant 0 : index
    %7 = vector.load %arg5[%c0_6, %c0_7] : memref<1x512xf32, #tpu.memory_space<vmem>>, vector<1x512xf32>
    %8 = vector.broadcast %7 : vector<1x512xf32> to vector<128x512xf32>
    %9 = arith.addf %6, %8 : vector<128x512xf32>
    %10 = vector.shape_cast %9 : vector<128x512xf32> to vector<16x8x512xf32>
    %c0_8 = arith.constant 0 : index
    %c0_9 = arith.constant 0 : index
    %c0_10 = arith.constant 0 : index
    %11 = vector.load %arg11[%c0_8, %c0_9, %c0_10] : memref<16x8x512xf32, #tpu.memory_space<vmem>>, vector<16x8x512xf32>
    tpu.vector_store %arg11[%c0_8, %c0_9, %c0_10], %10 {strides = array<i32>} : memref<16x8x512xf32, #tpu.memory_space<vmem>>, vector<16x8x512xf32>,
    %c0_11 = arith.constant 0 : index
    %c0_12 = arith.constant 0 : index
    %12 = vector.load %arg4[%c0_11, %c0_12] : memref<128x512xf32, #tpu.memory_space<vmem>>, vector<128x512xf32>
    %c0_13 = arith.constant 0 : index
    %c0_14 = arith.constant 0 : index
    %13 = vector.load %arg9[%c0_13, %c0_14] : memref<8x128xf32, #tpu.memory_space<vmem>>, vector<8x128xf32>
    %c0_15 = arith.constant 0 : index
    %c0_16 = arith.constant 0 : index
    %14 = vector.load %arg10[%c0_15, %c0_16] : memref<8x128xf32, #tpu.memory_space<vmem>>, vector<8x128xf32>
    %c0_i32_17 = arith.constant 0 : i32
    %15 = arith.index_cast %c0_i32_17 : i32 to index
    %c0_18 = arith.constant 0 : index
    %c0_19 = arith.constant 0 : index
    %16 = vector.load %arg11[%15, %c0_18, %c0_19] : memref<16x8x512xf32, #tpu.memory_space<vmem>>, vector<1x8x512xf32>
    %17 = vector.shape_cast %16 : vector<1x8x512xf32> to vector<8x512xf32>
    %cst_20 = arith.constant dense<0.000000e+00> : vector<8x512xf32>
    %18 = tpu.matmul %13, %12, %cst_20 {dimension_numbers = #tpu.dot_dimension_numbers<[1], [0], [0], [1], [0, 0, 1, 1], [], []>} : vector<8x128xf32>, vector<128x512xf32>, vector<8x512xf32> -> vector<8x512xf32>
    %19 = arith.addf %17, %18 : vector<8x512xf32>
    %20 = vector.extract_strided_slice %19 {offsets = [0, 0], sizes = [8, 384], strides = [1, 1]} : vector<8x512xf32> to vector<8x384xf32>
    %21 = math.tanh %20 : vector<8x384xf32>
    %cst_21 = arith.constant 5.000000e-01 : f32
    %22 = vector.broadcast %cst_21 : f32 to vector<8x384xf32>
    %23 = arith.mulf %21, %22 : vector<8x384xf32>
    %cst_22 = arith.constant 5.000000e-01 : f32
    %24 = vector.broadcast %cst_22 : f32 to vector<8x384xf32>
    %25 = arith.addf %23, %24 : vector<8x384xf32>
    %26 = vector.extract_strided_slice %19 {offsets = [0, 384], sizes = [8, 128], strides = [1, 1]} : vector<8x512xf32> to vector<8x128xf32>
    %27 = math.tanh %26 : vector<8x128xf32>
    %28 = vector.extract_strided_slice %25 {offsets = [0, 0], sizes = [8, 128], strides = [1, 1]} : vector<8x384xf32> to vector<8x128xf32>
    %29 = vector.extract_strided_slice %25 {offsets = [0, 128], sizes = [8, 128], strides = [1, 1]} : vector<8x384xf32> to vector<8x128xf32>
    %30 = vector.extract_strided_slice %25 {offsets = [0, 256], sizes = [8, 128], strides = [1, 1]} : vector<8x384xf32> to vector<8x128xf32>
    %31 = arith.mulf %29, %14 : vector<8x128xf32>
    %32 = arith.mulf %28, %27 : vector<8x128xf32>
    %33 = arith.addf %31, %32 : vector<8x128xf32>
    %34 = math.tanh %33 : vector<8x128xf32>
    %35 = arith.mulf %30, %34 : vector<8x128xf32>
    %c1_i32 = arith.constant 1 : i32
    %36 = arith.index_cast %c1_i32 : i32 to index
    %c0_23 = arith.constant 0 : index
    %c0_24 = arith.constant 0 : index
    %37 = vector.load %arg11[%36, %c0_23, %c0_24] : memref<16x8x512xf32, #tpu.memory_space<vmem>>, vector<1x8x512xf32>
    %38 = vector.shape_cast %37 : vector<1x8x512xf32> to vector<8x512xf32>
    %cst_25 = arith.constant dense<0.000000e+00> : vector<8x512xf32>
    %39 = tpu.matmul %35, %12, %cst_25 {dimension_numbers = #tpu.dot_dimension_numbers<[1], [0], [0], [1], [0, 0, 1, 1], [], []>} : vector<8x128xf32>, vector<128x512xf32>, vector<8x512xf32> -> vector<8x512xf32>
    %40 = arith.addf %38, %39 : vector<8x512xf32>
    %41 = vector.extract_strided_slice %40 {offsets = [0, 0], sizes = [8, 384], strides = [1, 1]} : vector<8x512xf32> to vector<8x384xf32>
    %42 = math.tanh %41 : vector<8x384xf32>
    %cst_26 = arith.constant 5.000000e-01 : f32
    %43 = vector.broadcast %cst_26 : f32 to vector<8x384xf32>
    %44 = arith.mulf %42, %43 : vector<8x384xf32>
    %cst_27 = arith.constant 5.000000e-01 : f32
    %45 = vector.broadcast %cst_27 : f32 to vector<8x384xf32>
    %46 = arith.addf %44, %45 : vector<8x384xf32>
    %47 = vector.extract_strided_slice %40 {offsets = [0, 384], sizes = [8, 128], strides = [1, 1]} : vector<8x512xf32> to vector<8x128xf32>
    %48 = math.tanh %47 : vector<8x128xf32>
    %49 = vector.extract_strided_slice %46 {offsets = [0, 0], sizes = [8, 128], strides = [1, 1]} : vector<8x384xf32> to vector<8x128xf32>
    %50 = vector.extract_strided_slice %46 {offsets = [0, 128], sizes = [8, 128], strides = [1, 1]} : vector<8x384xf32> to vector<8x128xf32>
    %51 = vector.extract_strided_slice %46 {offsets = [0, 256], sizes = [8, 128], strides = [1, 1]} : vector<8x384xf32> to vector<8x128xf32>
    %52 = arith.mulf %50, %33 : vector<8x128xf32>
    %53 = arith.mulf %49, %48 : vector<8x128xf32>
    %54 = arith.addf %52, %53 : vector<8x128xf32>
    %55 = math.tanh %54 : vector<8x128xf32>
    %56 = arith.mulf %51, %55 : vector<8x128xf32>
    %c2_i32 = arith.constant 2 : i32
    %57 = arith.index_cast %c2_i32 : i32 to index
    %c0_28 = arith.constant 0 : index
    %c0_29 = arith.constant 0 : index
    %58 = vector.load %arg11[%57, %c0_28, %c0_29] : memref<16x8x512xf32, #tpu.memory_space<vmem>>, vector<1x8x512xf32>
    %59 = vector.shape_cast %58 : vector<1x8x512xf32> to vector<8x512xf32>
    %cst_30 = arith.constant dense<0.000000e+00> : vector<8x512xf32>
    %60 = tpu.matmul %56, %12, %cst_30 {dimension_numbers = #tpu.dot_dimension_numbers<[1], [0], [0], [1], [0, 0, 1, 1], [], []>} : vector<8x128xf32>, vector<128x512xf32>, vector<8x512xf32> -> vector<8x512xf32>
    %61 = arith.addf %59, %60 : vector<8x512xf32>
    %62 = vector.extract_strided_slice %61 {offsets = [0, 0], sizes = [8, 384], strides = [1, 1]} : vector<8x512xf32> to vector<8x384xf32>
    %63 = math.tanh %62 : vector<8x384xf32>
    %cst_31 = arith.constant 5.000000e-01 : f32
    %64 = vector.broadcast %cst_31 : f32 to vector<8x384xf32>
    %65 = arith.mulf %63, %64 : vector<8x384xf32>
    %cst_32 = arith.constant 5.000000e-01 : f32
    %66 = vector.broadcast %cst_32 : f32 to vector<8x384xf32>
    %67 = arith.addf %65, %66 : vector<8x384xf32>
    %68 = vector.extract_strided_slice %61 {offsets = [0, 384], sizes = [8, 128], strides = [1, 1]} : vector<8x512xf32> to vector<8x128xf32>
    %69 = math.tanh %68 : vector<8x128xf32>
    %70 = vector.extract_strided_slice %67 {offsets = [0, 0], sizes = [8, 128], strides = [1, 1]} : vector<8x384xf32> to vector<8x128xf32>
    %71 = vector.extract_strided_slice %67 {offsets = [0, 128], sizes = [8, 128], strides = [1, 1]} : vector<8x384xf32> to vector<8x128xf32>
    %72 = vector.extract_strided_slice %67 {offsets = [0, 256], sizes = [8, 128], strides = [1, 1]} : vector<8x384xf32> to vector<8x128xf32>
    %73 = arith.mulf %71, %54 : vector<8x128xf32>
    %74 = arith.mulf %70, %69 : vector<8x128xf32>
    %75 = arith.addf %73, %74 : vector<8x128xf32>
    %76 = math.tanh %75 : vector<8x128xf32>
    %77 = arith.mulf %72, %76 : vector<8x128xf32>
    %c3_i32 = arith.constant 3 : i32
    %78 = arith.index_cast %c3_i32 : i32 to index
    %c0_33 = arith.constant 0 : index
    %c0_34 = arith.constant 0 : index
    %79 = vector.load %arg11[%78, %c0_33, %c0_34] : memref<16x8x512xf32, #tpu.memory_space<vmem>>, vector<1x8x512xf32>
    %80 = vector.shape_cast %79 : vector<1x8x512xf32> to vector<8x512xf32>
    %cst_35 = arith.constant dense<0.000000e+00> : vector<8x512xf32>
    %81 = tpu.matmul %77, %12, %cst_35 {dimension_numbers = #tpu.dot_dimension_numbers<[1], [0], [0], [1], [0, 0, 1, 1], [], []>} : vector<8x128xf32>, vector<128x512xf32>, vector<8x512xf32> -> vector<8x512xf32>
    %82 = arith.addf %80, %81 : vector<8x512xf32>
    %83 = vector.extract_strided_slice %82 {offsets = [0, 0], sizes = [8, 384], strides = [1, 1]} : vector<8x512xf32> to vector<8x384xf32>
    %84 = math.tanh %83 : vector<8x384xf32>
    %cst_36 = arith.constant 5.000000e-01 : f32
    %85 = vector.broadcast %cst_36 : f32 to vector<8x384xf32>
    %86 = arith.mulf %84, %85 : vector<8x384xf32>
    %cst_37 = arith.constant 5.000000e-01 : f32
    %87 = vector.broadcast %cst_37 : f32 to vector<8x384xf32>
    %88 = arith.addf %86, %87 : vector<8x384xf32>
    %89 = vector.extract_strided_slice %82 {offsets = [0, 384], sizes = [8, 128], strides = [1, 1]} : vector<8x512xf32> to vector<8x128xf32>
    %90 = math.tanh %89 : vector<8x128xf32>
    %91 = vector.extract_strided_slice %88 {offsets = [0, 0], sizes = [8, 128], strides = [1, 1]} : vector<8x384xf32> to vector<8x128xf32>
    %92 = vector.extract_strided_slice %88 {offsets = [0, 128], sizes = [8, 128], strides = [1, 1]} : vector<8x384xf32> to vector<8x128xf32>
    %93 = vector.extract_strided_slice %88 {offsets = [0, 256], sizes = [8, 128], strides = [1, 1]} : vector<8x384xf32> to vector<8x128xf32>
    %94 = arith.mulf %92, %75 : vector<8x128xf32>
    %95 = arith.mulf %91, %90 : vector<8x128xf32>
    %96 = arith.addf %94, %95 : vector<8x128xf32>
    %97 = math.tanh %96 : vector<8x128xf32>
    %98 = arith.mulf %93, %97 : vector<8x128xf32>
    %c4_i32 = arith.constant 4 : i32
    %99 = arith.index_cast %c4_i32 : i32 to index
    %c0_38 = arith.constant 0 : index
    %c0_39 = arith.constant 0 : index
    %100 = vector.load %arg11[%99, %c0_38, %c0_39] : memref<16x8x512xf32, #tpu.memory_space<vmem>>, vector<1x8x512xf32>
    %101 = vector.shape_cast %100 : vector<1x8x512xf32> to vector<8x512xf32>
    %cst_40 = arith.constant dense<0.000000e+00> : vector<8x512xf32>
    %102 = tpu.matmul %98, %12, %cst_40 {dimension_numbers = #tpu.dot_dimension_numbers<[1], [0], [0], [1], [0, 0, 1, 1], [], []>} : vector<8x128xf32>, vector<128x512xf32>, vector<8x512xf32> -> vector<8x512xf32>
    %103 = arith.addf %101, %102 : vector<8x512xf32>
    %104 = vector.extract_strided_slice %103 {offsets = [0, 0], sizes = [8, 384], strides = [1, 1]} : vector<8x512xf32> to vector<8x384xf32>
    %105 = math.tanh %104 : vector<8x384xf32>
    %cst_41 = arith.constant 5.000000e-01 : f32
    %106 = vector.broadcast %cst_41 : f32 to vector<8x384xf32>
    %107 = arith.mulf %105, %106 : vector<8x384xf32>
    %cst_42 = arith.constant 5.000000e-01 : f32
    %108 = vector.broadcast %cst_42 : f32 to vector<8x384xf32>
    %109 = arith.addf %107, %108 : vector<8x384xf32>
    %110 = vector.extract_strided_slice %103 {offsets = [0, 384], sizes = [8, 128], strides = [1, 1]} : vector<8x512xf32> to vector<8x128xf32>
    %111 = math.tanh %110 : vector<8x128xf32>
    %112 = vector.extract_strided_slice %109 {offsets = [0, 0], sizes = [8, 128], strides = [1, 1]} : vector<8x384xf32> to vector<8x128xf32>
    %113 = vector.extract_strided_slice %109 {offsets = [0, 128], sizes = [8, 128], strides = [1, 1]} : vector<8x384xf32> to vector<8x128xf32>
    %114 = vector.extract_strided_slice %109 {offsets = [0, 256], sizes = [8, 128], strides = [1, 1]} : vector<8x384xf32> to vector<8x128xf32>
    %115 = arith.mulf %113, %96 : vector<8x128xf32>
    %116 = arith.mulf %112, %111 : vector<8x128xf32>
    %117 = arith.addf %115, %116 : vector<8x128xf32>
    %118 = math.tanh %117 : vector<8x128xf32>
    %119 = arith.mulf %114, %118 : vector<8x128xf32>
    %c5_i32 = arith.constant 5 : i32
    %120 = arith.index_cast %c5_i32 : i32 to index
    %c0_43 = arith.constant 0 : index
    %c0_44 = arith.constant 0 : index
    %121 = vector.load %arg11[%120, %c0_43, %c0_44] : memref<16x8x512xf32, #tpu.memory_space<vmem>>, vector<1x8x512xf32>
    %122 = vector.shape_cast %121 : vector<1x8x512xf32> to vector<8x512xf32>
    %cst_45 = arith.constant dense<0.000000e+00> : vector<8x512xf32>
    %123 = tpu.matmul %119, %12, %cst_45 {dimension_numbers = #tpu.dot_dimension_numbers<[1], [0], [0], [1], [0, 0, 1, 1], [], []>} : vector<8x128xf32>, vector<128x512xf32>, vector<8x512xf32> -> vector<8x512xf32>
    %124 = arith.addf %122, %123 : vector<8x512xf32>
    %125 = vector.extract_strided_slice %124 {offsets = [0, 0], sizes = [8, 384], strides = [1, 1]} : vector<8x512xf32> to vector<8x384xf32>
    %126 = math.tanh %125 : vector<8x384xf32>
    %cst_46 = arith.constant 5.000000e-01 : f32
    %127 = vector.broadcast %cst_46 : f32 to vector<8x384xf32>
    %128 = arith.mulf %126, %127 : vector<8x384xf32>
    %cst_47 = arith.constant 5.000000e-01 : f32
    %129 = vector.broadcast %cst_47 : f32 to vector<8x384xf32>
    %130 = arith.addf %128, %129 : vector<8x384xf32>
    %131 = vector.extract_strided_slice %124 {offsets = [0, 384], sizes = [8, 128], strides = [1, 1]} : vector<8x512xf32> to vector<8x128xf32>
    %132 = math.tanh %131 : vector<8x128xf32>
    %133 = vector.extract_strided_slice %130 {offsets = [0, 0], sizes = [8, 128], strides = [1, 1]} : vector<8x384xf32> to vector<8x128xf32>
    %134 = vector.extract_strided_slice %130 {offsets = [0, 128], sizes = [8, 128], strides = [1, 1]} : vector<8x384xf32> to vector<8x128xf32>
    %135 = vector.extract_strided_slice %130 {offsets = [0, 256], sizes = [8, 128], strides = [1, 1]} : vector<8x384xf32> to vector<8x128xf32>
    %136 = arith.mulf %134, %117 : vector<8x128xf32>
    %137 = arith.mulf %133, %132 : vector<8x128xf32>
    %138 = arith.addf %136, %137 : vector<8x128xf32>
    %139 = math.tanh %138 : vector<8x128xf32>
    %140 = arith.mulf %135, %139 : vector<8x128xf32>
    %c6_i32 = arith.constant 6 : i32
    %141 = arith.index_cast %c6_i32 : i32 to index
    %c0_48 = arith.constant 0 : index
    %c0_49 = arith.constant 0 : index
    %142 = vector.load %arg11[%141, %c0_48, %c0_49] : memref<16x8x512xf32, #tpu.memory_space<vmem>>, vector<1x8x512xf32>
    %143 = vector.shape_cast %142 : vector<1x8x512xf32> to vector<8x512xf32>
    %cst_50 = arith.constant dense<0.000000e+00> : vector<8x512xf32>
    %144 = tpu.matmul %140, %12, %cst_50 {dimension_numbers = #tpu.dot_dimension_numbers<[1], [0], [0], [1], [0, 0, 1, 1], [], []>} : vector<8x128xf32>, vector<128x512xf32>, vector<8x512xf32> -> vector<8x512xf32>
    %145 = arith.addf %143, %144 : vector<8x512xf32>
    %146 = vector.extract_strided_slice %145 {offsets = [0, 0], sizes = [8, 384], strides = [1, 1]} : vector<8x512xf32> to vector<8x384xf32>
    %147 = math.tanh %146 : vector<8x384xf32>
    %cst_51 = arith.constant 5.000000e-01 : f32
    %148 = vector.broadcast %cst_51 : f32 to vector<8x384xf32>
    %149 = arith.mulf %147, %148 : vector<8x384xf32>
    %cst_52 = arith.constant 5.000000e-01 : f32
    %150 = vector.broadcast %cst_52 : f32 to vector<8x384xf32>
    %151 = arith.addf %149, %150 : vector<8x384xf32>
    %152 = vector.extract_strided_slice %145 {offsets = [0, 384], sizes = [8, 128], strides = [1, 1]} : vector<8x512xf32> to vector<8x128xf32>
    %153 = math.tanh %152 : vector<8x128xf32>
    %154 = vector.extract_strided_slice %151 {offsets = [0, 0], sizes = [8, 128], strides = [1, 1]} : vector<8x384xf32> to vector<8x128xf32>
    %155 = vector.extract_strided_slice %151 {offsets = [0, 128], sizes = [8, 128], strides = [1, 1]} : vector<8x384xf32> to vector<8x128xf32>
    %156 = vector.extract_strided_slice %151 {offsets = [0, 256], sizes = [8, 128], strides = [1, 1]} : vector<8x384xf32> to vector<8x128xf32>
    %157 = arith.mulf %155, %138 : vector<8x128xf32>
    %158 = arith.mulf %154, %153 : vector<8x128xf32>
    %159 = arith.addf %157, %158 : vector<8x128xf32>
    %160 = math.tanh %159 : vector<8x128xf32>
    %161 = arith.mulf %156, %160 : vector<8x128xf32>
    %c7_i32 = arith.constant 7 : i32
    %162 = arith.index_cast %c7_i32 : i32 to index
    %c0_53 = arith.constant 0 : index
    %c0_54 = arith.constant 0 : index
    %163 = vector.load %arg11[%162, %c0_53, %c0_54] : memref<16x8x512xf32, #tpu.memory_space<vmem>>, vector<1x8x512xf32>
    %164 = vector.shape_cast %163 : vector<1x8x512xf32> to vector<8x512xf32>
    %cst_55 = arith.constant dense<0.000000e+00> : vector<8x512xf32>
    %165 = tpu.matmul %161, %12, %cst_55 {dimension_numbers = #tpu.dot_dimension_numbers<[1], [0], [0], [1], [0, 0, 1, 1], [], []>} : vector<8x128xf32>, vector<128x512xf32>, vector<8x512xf32> -> vector<8x512xf32>
    %166 = arith.addf %164, %165 : vector<8x512xf32>
    %167 = vector.extract_strided_slice %166 {offsets = [0, 0], sizes = [8, 384], strides = [1, 1]} : vector<8x512xf32> to vector<8x384xf32>
    %168 = math.tanh %167 : vector<8x384xf32>
    %cst_56 = arith.constant 5.000000e-01 : f32
    %169 = vector.broadcast %cst_56 : f32 to vector<8x384xf32>
    %170 = arith.mulf %168, %169 : vector<8x384xf32>
    %cst_57 = arith.constant 5.000000e-01 : f32
    %171 = vector.broadcast %cst_57 : f32 to vector<8x384xf32>
    %172 = arith.addf %170, %171 : vector<8x384xf32>
    %173 = vector.extract_strided_slice %166 {offsets = [0, 384], sizes = [8, 128], strides = [1, 1]} : vector<8x512xf32> to vector<8x128xf32>
    %174 = math.tanh %173 : vector<8x128xf32>
    %175 = vector.extract_strided_slice %172 {offsets = [0, 0], sizes = [8, 128], strides = [1, 1]} : vector<8x384xf32> to vector<8x128xf32>
    %176 = vector.extract_strided_slice %172 {offsets = [0, 128], sizes = [8, 128], strides = [1, 1]} : vector<8x384xf32> to vector<8x128xf32>
    %177 = vector.extract_strided_slice %172 {offsets = [0, 256], sizes = [8, 128], strides = [1, 1]} : vector<8x384xf32> to vector<8x128xf32>
    %178 = arith.mulf %176, %159 : vector<8x128xf32>
    %179 = arith.mulf %175, %174 : vector<8x128xf32>
    %180 = arith.addf %178, %179 : vector<8x128xf32>
    %181 = math.tanh %180 : vector<8x128xf32>
    %182 = arith.mulf %177, %181 : vector<8x128xf32>
    %c8_i32 = arith.constant 8 : i32
    %183 = arith.index_cast %c8_i32 : i32 to index
    %c0_58 = arith.constant 0 : index
    %c0_59 = arith.constant 0 : index
    %184 = vector.load %arg11[%183, %c0_58, %c0_59] : memref<16x8x512xf32, #tpu.memory_space<vmem>>, vector<1x8x512xf32>
    %185 = vector.shape_cast %184 : vector<1x8x512xf32> to vector<8x512xf32>
    %cst_60 = arith.constant dense<0.000000e+00> : vector<8x512xf32>
    %186 = tpu.matmul %182, %12, %cst_60 {dimension_numbers = #tpu.dot_dimension_numbers<[1], [0], [0], [1], [0, 0, 1, 1], [], []>} : vector<8x128xf32>, vector<128x512xf32>, vector<8x512xf32> -> vector<8x512xf32>
    %187 = arith.addf %185, %186 : vector<8x512xf32>
    %188 = vector.extract_strided_slice %187 {offsets = [0, 0], sizes = [8, 384], strides = [1, 1]} : vector<8x512xf32> to vector<8x384xf32>
    %189 = math.tanh %188 : vector<8x384xf32>
    %cst_61 = arith.constant 5.000000e-01 : f32
    %190 = vector.broadcast %cst_61 : f32 to vector<8x384xf32>
    %191 = arith.mulf %189, %190 : vector<8x384xf32>
    %cst_62 = arith.constant 5.000000e-01 : f32
    %192 = vector.broadcast %cst_62 : f32 to vector<8x384xf32>
    %193 = arith.addf %191, %192 : vector<8x384xf32>
    %194 = vector.extract_strided_slice %187 {offsets = [0, 384], sizes = [8, 128], strides = [1, 1]} : vector<8x512xf32> to vector<8x128xf32>
    %195 = math.tanh %194 : vector<8x128xf32>
    %196 = vector.extract_strided_slice %193 {offsets = [0, 0], sizes = [8, 128], strides = [1, 1]} : vector<8x384xf32> to vector<8x128xf32>
    %197 = vector.extract_strided_slice %193 {offsets = [0, 128], sizes = [8, 128], strides = [1, 1]} : vector<8x384xf32> to vector<8x128xf32>
    %198 = vector.extract_strided_slice %193 {offsets = [0, 256], sizes = [8, 128], strides = [1, 1]} : vector<8x384xf32> to vector<8x128xf32>
    %199 = arith.mulf %197, %180 : vector<8x128xf32>
    %200 = arith.mulf %196, %195 : vector<8x128xf32>
    %201 = arith.addf %199, %200 : vector<8x128xf32>
    %202 = math.tanh %201 : vector<8x128xf32>
    %203 = arith.mulf %198, %202 : vector<8x128xf32>
    %c9_i32 = arith.constant 9 : i32
    %204 = arith.index_cast %c9_i32 : i32 to index
    %c0_63 = arith.constant 0 : index
    %c0_64 = arith.constant 0 : index
    %205 = vector.load %arg11[%204, %c0_63, %c0_64] : memref<16x8x512xf32, #tpu.memory_space<vmem>>, vector<1x8x512xf32>
    %206 = vector.shape_cast %205 : vector<1x8x512xf32> to vector<8x512xf32>
    %cst_65 = arith.constant dense<0.000000e+00> : vector<8x512xf32>
    %207 = tpu.matmul %203, %12, %cst_65 {dimension_numbers = #tpu.dot_dimension_numbers<[1], [0], [0], [1], [0, 0, 1, 1], [], []>} : vector<8x128xf32>, vector<128x512xf32>, vector<8x512xf32> -> vector<8x512xf32>
    %208 = arith.addf %206, %207 : vector<8x512xf32>
    %209 = vector.extract_strided_slice %208 {offsets = [0, 0], sizes = [8, 384], strides = [1, 1]} : vector<8x512xf32> to vector<8x384xf32>
    %210 = math.tanh %209 : vector<8x384xf32>
    %cst_66 = arith.constant 5.000000e-01 : f32
    %211 = vector.broadcast %cst_66 : f32 to vector<8x384xf32>
    %212 = arith.mulf %210, %211 : vector<8x384xf32>
    %cst_67 = arith.constant 5.000000e-01 : f32
    %213 = vector.broadcast %cst_67 : f32 to vector<8x384xf32>
    %214 = arith.addf %212, %213 : vector<8x384xf32>
    %215 = vector.extract_strided_slice %208 {offsets = [0, 384], sizes = [8, 128], strides = [1, 1]} : vector<8x512xf32> to vector<8x128xf32>
    %216 = math.tanh %215 : vector<8x128xf32>
    %217 = vector.extract_strided_slice %214 {offsets = [0, 0], sizes = [8, 128], strides = [1, 1]} : vector<8x384xf32> to vector<8x128xf32>
    %218 = vector.extract_strided_slice %214 {offsets = [0, 128], sizes = [8, 128], strides = [1, 1]} : vector<8x384xf32> to vector<8x128xf32>
    %219 = vector.extract_strided_slice %214 {offsets = [0, 256], sizes = [8, 128], strides = [1, 1]} : vector<8x384xf32> to vector<8x128xf32>
    %220 = arith.mulf %218, %201 : vector<8x128xf32>
    %221 = arith.mulf %217, %216 : vector<8x128xf32>
    %222 = arith.addf %220, %221 : vector<8x128xf32>
    %223 = math.tanh %222 : vector<8x128xf32>
    %224 = arith.mulf %219, %223 : vector<8x128xf32>
    %c10_i32 = arith.constant 10 : i32
    %225 = arith.index_cast %c10_i32 : i32 to index
    %c0_68 = arith.constant 0 : index
    %c0_69 = arith.constant 0 : index
    %226 = vector.load %arg11[%225, %c0_68, %c0_69] : memref<16x8x512xf32, #tpu.memory_space<vmem>>, vector<1x8x512xf32>
    %227 = vector.shape_cast %226 : vector<1x8x512xf32> to vector<8x512xf32>
    %cst_70 = arith.constant dense<0.000000e+00> : vector<8x512xf32>
    %228 = tpu.matmul %224, %12, %cst_70 {dimension_numbers = #tpu.dot_dimension_numbers<[1], [0], [0], [1], [0, 0, 1, 1], [], []>} : vector<8x128xf32>, vector<128x512xf32>, vector<8x512xf32> -> vector<8x512xf32>
    %229 = arith.addf %227, %228 : vector<8x512xf32>
    %230 = vector.extract_strided_slice %229 {offsets = [0, 0], sizes = [8, 384], strides = [1, 1]} : vector<8x512xf32> to vector<8x384xf32>
    %231 = math.tanh %230 : vector<8x384xf32>
    %cst_71 = arith.constant 5.000000e-01 : f32
    %232 = vector.broadcast %cst_71 : f32 to vector<8x384xf32>
    %233 = arith.mulf %231, %232 : vector<8x384xf32>
    %cst_72 = arith.constant 5.000000e-01 : f32
    %234 = vector.broadcast %cst_72 : f32 to vector<8x384xf32>
    %235 = arith.addf %233, %234 : vector<8x384xf32>
    %236 = vector.extract_strided_slice %229 {offsets = [0, 384], sizes = [8, 128], strides = [1, 1]} : vector<8x512xf32> to vector<8x128xf32>
    %237 = math.tanh %236 : vector<8x128xf32>
    %238 = vector.extract_strided_slice %235 {offsets = [0, 0], sizes = [8, 128], strides = [1, 1]} : vector<8x384xf32> to vector<8x128xf32>
    %239 = vector.extract_strided_slice %235 {offsets = [0, 128], sizes = [8, 128], strides = [1, 1]} : vector<8x384xf32> to vector<8x128xf32>
    %240 = vector.extract_strided_slice %235 {offsets = [0, 256], sizes = [8, 128], strides = [1, 1]} : vector<8x384xf32> to vector<8x128xf32>
    %241 = arith.mulf %239, %222 : vector<8x128xf32>
    %242 = arith.mulf %238, %237 : vector<8x128xf32>
    %243 = arith.addf %241, %242 : vector<8x128xf32>
    %244 = math.tanh %243 : vector<8x128xf32>
    %245 = arith.mulf %240, %244 : vector<8x128xf32>
    %c11_i32 = arith.constant 11 : i32
    %246 = arith.index_cast %c11_i32 : i32 to index
    %c0_73 = arith.constant 0 : index
    %c0_74 = arith.constant 0 : index
    %247 = vector.load %arg11[%246, %c0_73, %c0_74] : memref<16x8x512xf32, #tpu.memory_space<vmem>>, vector<1x8x512xf32>
    %248 = vector.shape_cast %247 : vector<1x8x512xf32> to vector<8x512xf32>
    %cst_75 = arith.constant dense<0.000000e+00> : vector<8x512xf32>
    %249 = tpu.matmul %245, %12, %cst_75 {dimension_numbers = #tpu.dot_dimension_numbers<[1], [0], [0], [1], [0, 0, 1, 1], [], []>} : vector<8x128xf32>, vector<128x512xf32>, vector<8x512xf32> -> vector<8x512xf32>
    %250 = arith.addf %248, %249 : vector<8x512xf32>
    %251 = vector.extract_strided_slice %250 {offsets = [0, 0], sizes = [8, 384], strides = [1, 1]} : vector<8x512xf32> to vector<8x384xf32>
    %252 = math.tanh %251 : vector<8x384xf32>
    %cst_76 = arith.constant 5.000000e-01 : f32
    %253 = vector.broadcast %cst_76 : f32 to vector<8x384xf32>
    %254 = arith.mulf %252, %253 : vector<8x384xf32>
    %cst_77 = arith.constant 5.000000e-01 : f32
    %255 = vector.broadcast %cst_77 : f32 to vector<8x384xf32>
    %256 = arith.addf %254, %255 : vector<8x384xf32>
    %257 = vector.extract_strided_slice %250 {offsets = [0, 384], sizes = [8, 128], strides = [1, 1]} : vector<8x512xf32> to vector<8x128xf32>
    %258 = math.tanh %257 : vector<8x128xf32>
    %259 = vector.extract_strided_slice %256 {offsets = [0, 0], sizes = [8, 128], strides = [1, 1]} : vector<8x384xf32> to vector<8x128xf32>
    %260 = vector.extract_strided_slice %256 {offsets = [0, 128], sizes = [8, 128], strides = [1, 1]} : vector<8x384xf32> to vector<8x128xf32>
    %261 = vector.extract_strided_slice %256 {offsets = [0, 256], sizes = [8, 128], strides = [1, 1]} : vector<8x384xf32> to vector<8x128xf32>
    %262 = arith.mulf %260, %243 : vector<8x128xf32>
    %263 = arith.mulf %259, %258 : vector<8x128xf32>
    %264 = arith.addf %262, %263 : vector<8x128xf32>
    %265 = math.tanh %264 : vector<8x128xf32>
    %266 = arith.mulf %261, %265 : vector<8x128xf32>
    %c12_i32 = arith.constant 12 : i32
    %267 = arith.index_cast %c12_i32 : i32 to index
    %c0_78 = arith.constant 0 : index
    %c0_79 = arith.constant 0 : index
    %268 = vector.load %arg11[%267, %c0_78, %c0_79] : memref<16x8x512xf32, #tpu.memory_space<vmem>>, vector<1x8x512xf32>
    %269 = vector.shape_cast %268 : vector<1x8x512xf32> to vector<8x512xf32>
    %cst_80 = arith.constant dense<0.000000e+00> : vector<8x512xf32>
    %270 = tpu.matmul %266, %12, %cst_80 {dimension_numbers = #tpu.dot_dimension_numbers<[1], [0], [0], [1], [0, 0, 1, 1], [], []>} : vector<8x128xf32>, vector<128x512xf32>, vector<8x512xf32> -> vector<8x512xf32>
    %271 = arith.addf %269, %270 : vector<8x512xf32>
    %272 = vector.extract_strided_slice %271 {offsets = [0, 0], sizes = [8, 384], strides = [1, 1]} : vector<8x512xf32> to vector<8x384xf32>
    %273 = math.tanh %272 : vector<8x384xf32>
    %cst_81 = arith.constant 5.000000e-01 : f32
    %274 = vector.broadcast %cst_81 : f32 to vector<8x384xf32>
    %275 = arith.mulf %273, %274 : vector<8x384xf32>
    %cst_82 = arith.constant 5.000000e-01 : f32
    %276 = vector.broadcast %cst_82 : f32 to vector<8x384xf32>
    %277 = arith.addf %275, %276 : vector<8x384xf32>
    %278 = vector.extract_strided_slice %271 {offsets = [0, 384], sizes = [8, 128], strides = [1, 1]} : vector<8x512xf32> to vector<8x128xf32>
    %279 = math.tanh %278 : vector<8x128xf32>
    %280 = vector.extract_strided_slice %277 {offsets = [0, 0], sizes = [8, 128], strides = [1, 1]} : vector<8x384xf32> to vector<8x128xf32>
    %281 = vector.extract_strided_slice %277 {offsets = [0, 128], sizes = [8, 128], strides = [1, 1]} : vector<8x384xf32> to vector<8x128xf32>
    %282 = vector.extract_strided_slice %277 {offsets = [0, 256], sizes = [8, 128], strides = [1, 1]} : vector<8x384xf32> to vector<8x128xf32>
    %283 = arith.mulf %281, %264 : vector<8x128xf32>
    %284 = arith.mulf %280, %279 : vector<8x128xf32>
    %285 = arith.addf %283, %284 : vector<8x128xf32>
    %286 = math.tanh %285 : vector<8x128xf32>
    %287 = arith.mulf %282, %286 : vector<8x128xf32>
    %c13_i32 = arith.constant 13 : i32
    %288 = arith.index_cast %c13_i32 : i32 to index
    %c0_83 = arith.constant 0 : index
    %c0_84 = arith.constant 0 : index
    %289 = vector.load %arg11[%288, %c0_83, %c0_84] : memref<16x8x512xf32, #tpu.memory_space<vmem>>, vector<1x8x512xf32>
    %290 = vector.shape_cast %289 : vector<1x8x512xf32> to vector<8x512xf32>
    %cst_85 = arith.constant dense<0.000000e+00> : vector<8x512xf32>
    %291 = tpu.matmul %287, %12, %cst_85 {dimension_numbers = #tpu.dot_dimension_numbers<[1], [0], [0], [1], [0, 0, 1, 1], [], []>} : vector<8x128xf32>, vector<128x512xf32>, vector<8x512xf32> -> vector<8x512xf32>
    %292 = arith.addf %290, %291 : vector<8x512xf32>
    %293 = vector.extract_strided_slice %292 {offsets = [0, 0], sizes = [8, 384], strides = [1, 1]} : vector<8x512xf32> to vector<8x384xf32>
    %294 = math.tanh %293 : vector<8x384xf32>
    %cst_86 = arith.constant 5.000000e-01 : f32
    %295 = vector.broadcast %cst_86 : f32 to vector<8x384xf32>
    %296 = arith.mulf %294, %295 : vector<8x384xf32>
    %cst_87 = arith.constant 5.000000e-01 : f32
    %297 = vector.broadcast %cst_87 : f32 to vector<8x384xf32>
    %298 = arith.addf %296, %297 : vector<8x384xf32>
    %299 = vector.extract_strided_slice %292 {offsets = [0, 384], sizes = [8, 128], strides = [1, 1]} : vector<8x512xf32> to vector<8x128xf32>
    %300 = math.tanh %299 : vector<8x128xf32>
    %301 = vector.extract_strided_slice %298 {offsets = [0, 0], sizes = [8, 128], strides = [1, 1]} : vector<8x384xf32> to vector<8x128xf32>
    %302 = vector.extract_strided_slice %298 {offsets = [0, 128], sizes = [8, 128], strides = [1, 1]} : vector<8x384xf32> to vector<8x128xf32>
    %303 = vector.extract_strided_slice %298 {offsets = [0, 256], sizes = [8, 128], strides = [1, 1]} : vector<8x384xf32> to vector<8x128xf32>
    %304 = arith.mulf %302, %285 : vector<8x128xf32>
    %305 = arith.mulf %301, %300 : vector<8x128xf32>
    %306 = arith.addf %304, %305 : vector<8x128xf32>
    %307 = math.tanh %306 : vector<8x128xf32>
    %308 = arith.mulf %303, %307 : vector<8x128xf32>
    %c14_i32 = arith.constant 14 : i32
    %309 = arith.index_cast %c14_i32 : i32 to index
    %c0_88 = arith.constant 0 : index
    %c0_89 = arith.constant 0 : index
    %310 = vector.load %arg11[%309, %c0_88, %c0_89] : memref<16x8x512xf32, #tpu.memory_space<vmem>>, vector<1x8x512xf32>
    %311 = vector.shape_cast %310 : vector<1x8x512xf32> to vector<8x512xf32>
    %cst_90 = arith.constant dense<0.000000e+00> : vector<8x512xf32>
    %312 = tpu.matmul %308, %12, %cst_90 {dimension_numbers = #tpu.dot_dimension_numbers<[1], [0], [0], [1], [0, 0, 1, 1], [], []>} : vector<8x128xf32>, vector<128x512xf32>, vector<8x512xf32> -> vector<8x512xf32>
    %313 = arith.addf %311, %312 : vector<8x512xf32>
    %314 = vector.extract_strided_slice %313 {offsets = [0, 0], sizes = [8, 384], strides = [1, 1]} : vector<8x512xf32> to vector<8x384xf32>
    %315 = math.tanh %314 : vector<8x384xf32>
    %cst_91 = arith.constant 5.000000e-01 : f32
    %316 = vector.broadcast %cst_91 : f32 to vector<8x384xf32>
    %317 = arith.mulf %315, %316 : vector<8x384xf32>
    %cst_92 = arith.constant 5.000000e-01 : f32
    %318 = vector.broadcast %cst_92 : f32 to vector<8x384xf32>
    %319 = arith.addf %317, %318 : vector<8x384xf32>
    %320 = vector.extract_strided_slice %313 {offsets = [0, 384], sizes = [8, 128], strides = [1, 1]} : vector<8x512xf32> to vector<8x128xf32>
    %321 = math.tanh %320 : vector<8x128xf32>
    %322 = vector.extract_strided_slice %319 {offsets = [0, 0], sizes = [8, 128], strides = [1, 1]} : vector<8x384xf32> to vector<8x128xf32>
    %323 = vector.extract_strided_slice %319 {offsets = [0, 128], sizes = [8, 128], strides = [1, 1]} : vector<8x384xf32> to vector<8x128xf32>
    %324 = vector.extract_strided_slice %319 {offsets = [0, 256], sizes = [8, 128], strides = [1, 1]} : vector<8x384xf32> to vector<8x128xf32>
    %325 = arith.mulf %323, %306 : vector<8x128xf32>
    %326 = arith.mulf %322, %321 : vector<8x128xf32>
    %327 = arith.addf %325, %326 : vector<8x128xf32>
    %328 = math.tanh %327 : vector<8x128xf32>
    %329 = arith.mulf %324, %328 : vector<8x128xf32>
    %c15_i32 = arith.constant 15 : i32
    %330 = arith.index_cast %c15_i32 : i32 to index
    %c0_93 = arith.constant 0 : index
    %c0_94 = arith.constant 0 : index
    %331 = vector.load %arg11[%330, %c0_93, %c0_94] : memref<16x8x512xf32, #tpu.memory_space<vmem>>, vector<1x8x512xf32>
    %332 = vector.shape_cast %331 : vector<1x8x512xf32> to vector<8x512xf32>
    %cst_95 = arith.constant dense<0.000000e+00> : vector<8x512xf32>
    %333 = tpu.matmul %329, %12, %cst_95 {dimension_numbers = #tpu.dot_dimension_numbers<[1], [0], [0], [1], [0, 0, 1, 1], [], []>} : vector<8x128xf32>, vector<128x512xf32>, vector<8x512xf32> -> vector<8x512xf32>
    %334 = arith.addf %332, %333 : vector<8x512xf32>
    %335 = vector.extract_strided_slice %334 {offsets = [0, 0], sizes = [8, 384], strides = [1, 1]} : vector<8x512xf32> to vector<8x384xf32>
    %336 = math.tanh %335 : vector<8x384xf32>
    %cst_96 = arith.constant 5.000000e-01 : f32
    %337 = vector.broadcast %cst_96 : f32 to vector<8x384xf32>
    %338 = arith.mulf %336, %337 : vector<8x384xf32>
    %cst_97 = arith.constant 5.000000e-01 : f32
    %339 = vector.broadcast %cst_97 : f32 to vector<8x384xf32>
    %340 = arith.addf %338, %339 : vector<8x384xf32>
    %341 = vector.extract_strided_slice %334 {offsets = [0, 384], sizes = [8, 128], strides = [1, 1]} : vector<8x512xf32> to vector<8x128xf32>
    %342 = math.tanh %341 : vector<8x128xf32>
    %343 = vector.extract_strided_slice %340 {offsets = [0, 0], sizes = [8, 128], strides = [1, 1]} : vector<8x384xf32> to vector<8x128xf32>
    %344 = vector.extract_strided_slice %340 {offsets = [0, 128], sizes = [8, 128], strides = [1, 1]} : vector<8x384xf32> to vector<8x128xf32>
    %345 = vector.extract_strided_slice %340 {offsets = [0, 256], sizes = [8, 128], strides = [1, 1]} : vector<8x384xf32> to vector<8x128xf32>
    %346 = arith.mulf %344, %327 : vector<8x128xf32>
    %347 = arith.mulf %343, %342 : vector<8x128xf32>
    %348 = arith.addf %346, %347 : vector<8x128xf32>
    %349 = math.tanh %348 : vector<8x128xf32>
    %350 = arith.mulf %345, %349 : vector<8x128xf32>
    %c16_i32 = arith.constant 16 : i32
    %c0_98 = arith.constant 0 : index
    %c0_99 = arith.constant 0 : index
    %351 = vector.load %arg9[%c0_98, %c0_99] : memref<8x128xf32, #tpu.memory_space<vmem>>, vector<8x128xf32>
    tpu.vector_store %arg9[%c0_98, %c0_99], %350 {strides = array<i32>} : memref<8x128xf32, #tpu.memory_space<vmem>>, vector<8x128xf32>,
    %c0_100 = arith.constant 0 : index
    %c0_101 = arith.constant 0 : index
    %352 = vector.load %arg10[%c0_100, %c0_101] : memref<8x128xf32, #tpu.memory_space<vmem>>, vector<8x128xf32>
    tpu.vector_store %arg10[%c0_100, %c0_101], %348 {strides = array<i32>} : memref<8x128xf32, #tpu.memory_space<vmem>>, vector<8x128xf32>,
    %c0_i32_102 = arith.constant 0 : i32
    %353 = arith.cmpi eq, %arg1, %c0_i32_102 : i32
    %354 = arith.extui %353 : i1 to i32
    %c0_i32_103 = arith.constant 0 : i32
    %355 = arith.cmpi ne, %354, %c0_i32_103 : i32
    scf.if %355 {
      %c0_104 = arith.constant 0 : index
      %c0_105 = arith.constant 0 : index
      %356 = vector.load %arg6[%c0_104, %c0_105] : memref<128x128xf32, #tpu.memory_space<vmem>>, vector<128x128xf32>
      %cst_106 = arith.constant dense<0.000000e+00> : vector<8x128xf32>
      %357 = tpu.matmul %350, %356, %cst_106 {dimension_numbers = #tpu.dot_dimension_numbers<[1], [0], [0], [1], [0, 0, 1, 1], [], []>} : vector<8x128xf32>, vector<128x128xf32>, vector<8x128xf32> -> vector<8x128xf32>
      %c0_107 = arith.constant 0 : index
      %c0_108 = arith.constant 0 : index
      %358 = vector.load %arg7[%c0_107, %c0_108] : memref<1x128xf32, #tpu.memory_space<vmem>>, vector<1x128xf32>
      %359 = vector.broadcast %358 : vector<1x128xf32> to vector<8x128xf32>
      %360 = arith.addf %357, %359 : vector<8x128xf32>
      %c0_109 = arith.constant 0 : index
      %c0_110 = arith.constant 0 : index
      %361 = vector.load %arg8[%c0_109, %c0_110] : memref<8x128xf32, #tpu.memory_space<vmem>>, vector<8x128xf32>
      tpu.vector_store %arg8[%c0_109, %c0_110], %360 {strides = array<i32>} : memref<8x128xf32, #tpu.memory_space<vmem>>, vector<8x128xf32>,
    } else {
    }
    return
  }
  func.func @transform_0(%arg0: i32, %arg1: i32) -> (i32, i32, i32, i32) {
    %c0_i32 = arith.constant 0 : i32
    %c0_i32_0 = arith.constant 0 : i32
    %c0_i32_1 = arith.constant 0 : i32
    return %arg1, %c0_i32, %arg0, %c0_i32_0 : i32, i32, i32, i32
  }
  func.func @transform_1(%arg0: i32, %arg1: i32) -> (i32, i32) {
    %c0_i32 = arith.constant 0 : i32
    %c0_i32_0 = arith.constant 0 : i32
    %c0_i32_1 = arith.constant 0 : i32
    return %c0_i32, %c0_i32_0 : i32, i32
  }
  func.func @transform_2(%arg0: i32, %arg1: i32) -> (i32, i32) {
    %c0_i32 = arith.constant 0 : i32
    %c0_i32_0 = arith.constant 0 : i32
    %c0_i32_1 = arith.constant 0 : i32
    return %c0_i32, %c0_i32_0 : i32, i32
  }
  func.func @transform_3(%arg0: i32, %arg1: i32) -> (i32, i32) {
    %c0_i32 = arith.constant 0 : i32
    %c0_i32_0 = arith.constant 0 : i32
    %c0_i32_1 = arith.constant 0 : i32
    return %c0_i32, %c0_i32_0 : i32, i32
  }
  func.func @transform_4(%arg0: i32, %arg1: i32) -> (i32, i32) {
    %c0_i32 = arith.constant 0 : i32
    %c0_i32_0 = arith.constant 0 : i32
    %c0_i32_1 = arith.constant 0 : i32
    return %c0_i32, %c0_i32_0 : i32, i32
  }
  func.func @transform_5(%arg0: i32, %arg1: i32) -> (i32, i32) {
    %c0_i32 = arith.constant 0 : i32
    %c0_i32_0 = arith.constant 0 : i32
    %c0_i32_1 = arith.constant 0 : i32
    return %c0_i32, %c0_i32_0 : i32, i32
  }
  func.func @transform_6(%arg0: i32, %arg1: i32) -> (i32, i32) {
    %c0_i32 = arith.constant 0 : i32
    %c0_i32_0 = arith.constant 0 : i32
    return %arg0, %c0_i32 : i32, i32
  }
}

</mosaic_0001>

<bundles_post_ra>
// kernel: tpu_custom_call.1
= control target key start
LH: loop header
LB: loop body
LE: loop exit
PB: predicated region body
PF: predicated region fallthrough
CT: control target
= control target key end

     0   :  { %11 = vsyncpa [#allocation6], 0  ;;  %s5975_s0 = inlined_call_operand.hbm [shape: f32[1,16,8,16], index: 0, kind: input, shape index: {}]   ;;  %s5976_s1 = inlined_call_operand.hbm [shape: f32[16,512], index: 1, kind: input, shape index: {}]   ;;  %s5977_s2 = inlined_call_operand.hbm [shape: f32[128,512], index: 2, kind: input, shape index: {}]   ;;  %s5978_s3 = inlined_call_operand.vmem [shape: f32[1,512], index: 3, kind: input, shape index: {}]   ;;  %s5979_s4 = inlined_call_operand.hbm [shape: f32[128,128], index: 4, kind: input, shape index: {}]   ;;  %s5980_s5 = inlined_call_operand.vmem [shape: f32[1,128], index: 5, kind: input, shape index: {}]   ;;  %s5981_s6 = inlined_call_operand.hbm [shape: f32[8,128], index: 6, kind: output, shape index: {}]  }
   0x1   :  { %12 = vsyncpa [#allocation9], 0 }
   0x2   :  { %13 = vsyncpa [#allocation12], 0 }
   0x3   :  { %14 = vsyncpa [#allocation7], 0  ;;  %s4964_s21 = smov [#allocation8]   ;;  %s4846_s25 = scalar_lea.hbm %s5976_s1, 1024 }
   0x4   :  { %s32_s22 = sshll.u32 %s4964_s21, 4  ;;  %p4847_p0 = scmp.ne.s32.totalorder %s5976_s1, %s4846_s25  ;;  %s33_s22 = int_to_ptr.vmem [resolvable:$true] %s32_s22 }
   0x5   :  { %p4850_p1 = scmp.lt.u32.totalorder %s4846_s25, %s5976_s1 }
   0x7   :  { %p4852_p2 = pnand %p4850_p1, %p4847_p0 }
   0x9   :  { %4855 = shalt.err (!%p4852_p2)
}
   0xa   :  { %s4856_s30 = scalar_lea.vmem %s33_s22, 1024  ;;  %p4861_p4 = scmp.lt.s32.totalorder %s33_s22, %s33_s22 }
   0xb   :  { %p4857_p3 = scmp.ne.s32.totalorder %s33_s22, %s4856_s30  ;;  %p4862_p5 = scmp.lt.s32.totalorder %s4856_s30, %s4856_s30 }
   0xd   :  { %p4863_p6 = por %p4862_p5, %p4861_p4 }
   0xf   :  { %p4864_p7 = pnand %p4863_p6, %p4857_p3 }
  0x11   :  { %4867 = shalt.err (!%p4864_p7)
}
  0x12   :  { %s4965_s7 = smov 512   ;;  %s4966_s8 = smov 32  }
  0x13   :  { %38 = dma.hbm_to_vmem [thread:$0]  %s5976_s1, 1024, %s33_s22, [#allocation9], %s4965_s7, %s4965_s7, %s4966_s8  }
  0x14   :  { %s4967_s11 = smov [#allocation5]   ;;  %s4868_s15 = scalar_lea.hbm %s5975_s0, 2048 }
  0x15   :  { %s20_s12 = sshll.u32 %s4967_s11, 4  ;;  %p4869_p8 = scmp.ne.s32.totalorder %s5975_s0, %s4868_s15  ;;  %s21_s12 = int_to_ptr.vmem [resolvable:$true] %s20_s12 }
  0x16   :  { %p4872_p9 = scmp.lt.u32.totalorder %s4868_s15, %s5975_s0 }
  0x18   :  { %p4874_p10 = pnand %p4872_p9, %p4869_p8 }
  0x1a   :  { %4877 = shalt.err (!%p4874_p10)
}
  0x1b   :  { %s4878_s20 = scalar_lea.vmem %s21_s12, 2048  ;;  %p4883_p12 = scmp.lt.s32.totalorder %s21_s12, %s21_s12 }
  0x1c   :  { %p4879_p11 = scmp.ne.s32.totalorder %s21_s12, %s4878_s20  ;;  %p4884_p13 = scmp.lt.s32.totalorder %s4878_s20, %s4878_s20 }
  0x1e   :  { %p4885_p0 = por %p4884_p13, %p4883_p12 }
  0x20   :  { %p4886_p1 = pnand %p4885_p0, %p4879_p11 }
  0x22   :  { %4889 = shalt.err (!%p4886_p1)
}
  0x23   :  { %s4968_s1 = smov 128   ;;  %s4969_s21 = smov 8  }
  0x24   :  { %26 = dma.hbm_to_vmem [thread:$0]  %s5975_s0, 2048, %s21_s12, [#allocation6], %s4968_s1, %s4968_s1, %s4969_s21  }
  0x25   :  { %s4970_s24 = smov [#allocation10]   ;;  %s4971_s26 = smov [#allocation11]  }
  0x26   :  { %s44_s25 = sshll.u32 %s4970_s24, 4  ;;  %s58_s27 = sshll.u32 %s4971_s26, 4  ;;  %s45_s25 = int_to_ptr.vmem [resolvable:$true] %s44_s25  ;;  %s5041_s27 = int_to_ptr.vmem [resolvable:$true] %s58_s27 }
  0x27   :  { %s4890_s30 = scalar_lea.hbm %s5977_s2, 8192 }
  0x28   :  { %p4891_p2 = scmp.ne.s32.totalorder %s5977_s2, %s4890_s30  ;;  %p4894_p3 = scmp.lt.u32.totalorder %s4890_s30, %s5977_s2 }
  0x2a   :  { %p4896_p4 = pnand %p4894_p3, %p4891_p2 }
  0x2c   :  { %4899 = shalt.err (!%p4896_p4)
}
  0x2d   :  { %s4900_s0 = scalar_lea.vmem %s45_s25, 8192  ;;  %p4905_p6 = scmp.lt.s32.totalorder %s45_s25, %s45_s25 }
  0x2e   :  { %p4901_p5 = scmp.ne.s32.totalorder %s45_s25, %s4900_s0  ;;  %p4906_p7 = scmp.lt.s32.totalorder %s4900_s0, %s4900_s0 }
  0x30   :  { %p4907_p8 = por %p4906_p7, %p4905_p6 }
  0x32   :  { %p4908_p9 = pnand %p4907_p8, %p4901_p5 }
  0x34   :  { %4911 = shalt.err (!%p4908_p9)
}
  0x35   :  { %50 = dma.hbm_to_vmem [thread:$0]  %s5977_s2, 8192, %s45_s25, [#allocation9], %s4965_s7, %s4965_s7, %s4966_s8  }
  0x36   :  { %s4912_s17 = scalar_lea.hbm %s5979_s4, 2048 }
  0x37   :  { %p4913_p10 = scmp.ne.s32.totalorder %s5979_s4, %s4912_s17  ;;  %p4916_p11 = scmp.lt.u32.totalorder %s4912_s17, %s5979_s4 }
  0x39   :  { %p4918_p12 = pnand %p4916_p11, %p4913_p10 }
  0x3b   :  { %4921 = shalt.err (!%p4918_p12)
}
  0x3c   :  { %s4922_s23 = scalar_lea.vmem %s5041_s27, 2048  ;;  %p4927_p0 = scmp.lt.s32.totalorder %s5041_s27, %s5041_s27 }
  0x3d   :  { %p4923_p13 = scmp.ne.s32.totalorder %s5041_s27, %s4922_s23  ;;  %p4928_p1 = scmp.lt.s32.totalorder %s4922_s23, %s4922_s23 }
  0x3f   :  { %p4929_p2 = por %p4928_p1, %p4927_p0 }
  0x41   :  { %p4930_p3 = pnand %p4929_p2, %p4923_p13 }
  0x43   :  { %4933 = shalt.err (!%p4930_p3)
}
  0x44   :  { %64 = dma.hbm_to_vmem [thread:$0]  %s5979_s4, 2048, %s5041_s27, [#allocation12], %s4968_s1, %s4968_s1, %s4969_s21  }
  0x45   :  { %4956 = dma.done.wait [#allocation6], 2048  }
  0x46   :  { %4957 = vsyncadd [#allocation6], 4294965248 }
  0x47   :  { %4958 = dma.done.wait [#allocation9], 9216  }
  0x48   :  { %4959 = vsyncadd [#allocation9], 4294958080 }
  0x49   :  { %4960 = dma.done.wait [#allocation12], 2048  }
  0x4a   :  { %4961 = vsyncadd [#allocation12], 4294965248  ;;  %v4972_v0 = vmov 0.0   ;;  %v102_v1 = vld [vmem:[#allocation8 + $0x8] sm:$0xff]  ;;  %v101_v3 = vld [vmem:[#allocation8] sm:$0xff]  ;;  %vm131_vm0 = vcmask 130048  }
  0x4b   :  { %244 = vmatprep.mubr.f32.mxu0 %v4972_v0  ;;  %316 = vmatprep.mubr.f32.mxu1 %v4972_v0  ;;  %v106_v2 = vld [vmem:[#allocation8 + $0x28] sm:$0xff]  ;;  %v105_v5 = vld [vmem:[#allocation8 + $0x20] sm:$0xff]  ;;  %v104_v7 = vld [vmem:[#allocation8 + $0x18] sm:$0xff]  ;;  %vm4974_vm1 = vmmov 0   ;;  %s4975_s21 = smov [#allocation13]  }
  0x4c   :  { %v3488_v4 = vpack.c.bf16 %v106_v2, %v102_v1  ;;  %v3490_v6 = vpack.c.bf16 %v105_v5, %v101_v3  ;;  %v108_v8 = vld [vmem:[#allocation8 + $0x38] sm:$0xff]  ;;  %v103_v9 = vld [vmem:[#allocation8 + $0x10] sm:$0xff]  ;;  %v5080_v12 = vld [vmem:[#allocation5] sm:$0xff]  ;;  %s3392_s24 = sshll.u32 %s4975_s21, 4  ;;  %s3393_s24 = int_to_ptr.vmem [resolvable:$true] %s3392_s24 }
  0x4d   :  { %v3492_v10 = vpack.c.bf16 %v108_v8, %v104_v7  ;;  %v107_v11 = vld [vmem:[#allocation8 + $0x30] sm:$0xff]  ;;  %v5082_v13 = vld [vmem:[#allocation5 + $0x60] sm:$0xff]  ;;  %v567_v15 = vld [vmem:[#allocation10 + $0x8] sm:$0xff]  ;;  %s4934_s25 = scalar_lea.vmem %s3393_s24, 128  ;;  %p4939_p5 = scmp.lt.s32.totalorder %s3393_s24, %s3393_s24 }
  0x4e   :  { %3489 = vmatprep.subr.bf16.mxu0 %v3488_v4  ;;  %4544 = vmatprep.subr.bf16.mxu1 %v3488_v4  ;;  %v3494_v14 = vpack.c.bf16 %v107_v11, %v103_v9  ;;  %v571_v16 = vld [vmem:[#allocation10 + $0x28] sm:$0xff]  ;;  %v569_v17 = vld [vmem:[#allocation10 + $0x18] sm:$0xff]  ;;  %v566_v21 = vld [vmem:[#allocation10] sm:$0xff]  ;;  %p4935_p4 = scmp.ne.s32.totalorder %s3393_s24, %s4934_s25  ;;  %p4940_p6 = scmp.lt.s32.totalorder %s4934_s25, %s4934_s25 }
  0x4f   :  { %3491 = vmatpush1.bf16.msra.mxu0 %v3490_v6  ;;  %4545 = vmatpush1.bf16.msra.mxu1 %v3490_v6  ;;  %v573_v18 = vld [vmem:[#allocation10 + $0x38] sm:$0xff]  ;;  %v5088_v19 = vpack.c.bf16 %v571_v16, %v567_v15  ;;  %v570_v22 = vld [vmem:[#allocation10 + $0x20] sm:$0xff]  ;;  %v5093_v23 = vld [vmem:[#allocation5 + $0x8] sm:$0xff] }
  0x50   :  { %3493 = vmatprep.subr.bf16.mxu1 %v3492_v10  ;;  %v5090_v20 = vpack.c.bf16 %v573_v18, %v569_v17  ;;  %v5095_v24 = vld [vmem:[#allocation5 + $0x68] sm:$0xff]  ;;  %v5097_v25 = vpack.c.bf16 %v570_v22, %v566_v21  ;;  %v574_v28 = vld [vmem:[#allocation10 + $0x40] sm:$0xff]  ;;  %v5113_v35 = vld [vmem:[#allocation5 + $0x10] sm:$0xff]  ;;  %p4941_p7 = por %p4940_p6, %p4939_p5 }
  0x51   :  { %v575_v26 = vld [vmem:[#allocation10 + $0x48] sm:$0xff]  ;;  %3497 = vmatprep.subr.bf16.mxu0 %v5088_v19  ;;  %v578_v29 = vld [vmem:[#allocation10 + $0x60] sm:$0xff]  ;;  %v5115_v36 = vld [vmem:[#allocation5 + $0x70] sm:$0xff] }
  0x52   :  { %3403 = vmatmul.mubr.msk.f32.vlgmr.msra.gmra.mrb[0].mxu0 %vm131_vm0, %v5080_v12  ;;  %3415 = vmatmul.mubr.msk.f32.vlgmr.msra.gmra.mrb[0].mxu1 %vm131_vm0, %v5082_v13  ;;  %v579_v27 = vld [vmem:[#allocation10 + $0x68] sm:$0xff]  ;;  %v5105_v31 = vpack.c.bf16 %v578_v29, %v574_v28  ;;  %v582_v34 = vld [vmem:[#allocation10 + $0x80] sm:$0xff]  ;;  %v5129_v44 = vld [vmem:[#allocation5 + $0x18] sm:$0xff]  ;;  %p4942_p8 = pnand %p4941_p7, %p4935_p4 }
  0x53   :  { %3495 = vmatpush1.bf16.msra.mxu1 %v3494_v14  ;;  %250 = vmatprep.mubr.f32.mxu0 %v4972_v0  ;;  %v5103_v30 = vpack.c.bf16 %v579_v27, %v575_v26  ;;  %v583_v32 = vld [vmem:[#allocation10 + $0x88] sm:$0xff]  ;;  %v586_v37 = vld [vmem:[#allocation10 + $0xa0] sm:$0xff]  ;;  %v5131_v45 = vld [vmem:[#allocation5 + $0x78] sm:$0xff] }
  0x54   :  { %322 = vmatprep.mubr.f32.mxu1 %v4972_v0  ;;  %3529 = vmatprep.subr.bf16.mxu1 %v5090_v20  ;;  %v587_v33 = vld [vmem:[#allocation10 + $0xa8] sm:$0xff]  ;;  %v5121_v39 = vpack.c.bf16 %v586_v37, %v582_v34  ;;  %v590_v42 = vld [vmem:[#allocation10 + $0xc0] sm:$0xff]  ;;  %v568_v46 = vld [vmem:[#allocation10 + $0x10] sm:$0xff] }
  0x55   :  { %3499 = vmatpush1.bf16.msra.mxu0 %v5097_v25  ;;  %v5118_v38 = vpack.c.bf16 %v587_v33, %v583_v32  ;;  %v591_v40 = vld [vmem:[#allocation10 + $0xc8] sm:$0xff]  ;;  %v594_v43 = vld [vmem:[#allocation10 + $0xe0] sm:$0xff]  ;;  %v572_v47 = vld [vmem:[#allocation10 + $0x30] sm:$0xff] }
  0x56   :  { %3404 = vmatmul.mubr.msk.f32.gmra.mrb[2].mxu0 %vm131_vm0, %v5093_v23  ;;  %3416 = vmatmul.mubr.msk.f32.gmra.mrb[2].mxu1 %vm131_vm0, %v5095_v24  ;;  %v595_v41 = vld [vmem:[#allocation10 + $0xe8] sm:$0xff]  ;;  %v577_v49 = vld [vmem:[#allocation10 + $0x58] sm:$0xff]  ;;  %v5137_v51 = vpack.c.bf16 %v594_v43, %v590_v42  ;;  %v5145_v54 = vld [vmem:[#allocation5 + $0x20] sm:$0xff]  ;;  %v5147_v55 = vpack.c.bf16 %v572_v47, %v568_v46 }
  0x57   :  { %256 = vmatprep.mubr.f32.mxu0 %v4972_v0  ;;  %328 = vmatprep.mubr.f32.mxu1 %v4972_v0  ;;  %v5134_v48 = vpack.c.bf16 %v595_v41, %v591_v40  ;;  %v581_v50 = vld [vmem:[#allocation10 + $0x78] sm:$0xff]  ;;  %v599_v52 = vld [vmem:[#allocation10 + $0x108] sm:$0xff]  ;;  %v576_v57 = vld [vmem:[#allocation10 + $0x50] sm:$0xff] }
  0x58   :  { %3501 = vmatprep.subr.bf16.mxu0 %v5103_v30  ;;  %v603_v53 = vld [vmem:[#allocation10 + $0x128] sm:$0xff]  ;;  %v5149_v56 = vpack.c.bf16 %v581_v50, %v577_v49  ;;  %v580_v58 = vld [vmem:[#allocation10 + $0x70] sm:$0xff]  ;;  %v585_v60 = vld [vmem:[#allocation10 + $0x98] sm:$0xff] }
  0x59   :  { %3503 = vmatpush1.bf16.msra.mxu0 %v5105_v31  ;;  %v5153_v59 = vpack.c.bf16 %v603_v53, %v599_v52  ;;  %v598_v61 = vld [vmem:[#allocation10 + $0x100] sm:$0xff]  ;;  %v589_v63 = vld [vmem:[#allocation10 + $0xb8] sm:$0xff]  ;;  %v607_v1 = vld [vmem:[#allocation10 + $0x148] sm:$0xff]  ;;  %v5165_v4 = vpack.c.bf16 %v580_v58, %v576_v57 }
  0x5a   :  { %3405 = vmatmul.mubr.msk.f32.gmra.mrb[4].mxu0 %vm131_vm0, %v5113_v35  ;;  %3417 = vmatmul.mubr.msk.f32.gmra.mrb[4].mxu1 %vm131_vm0, %v5115_v36  ;;  %v602_v62 = vld [vmem:[#allocation10 + $0x120] sm:$0xff]  ;;  %v611_v2 = vld [vmem:[#allocation10 + $0x168] sm:$0xff]  ;;  %v584_v6 = vld [vmem:[#allocation10 + $0x90] sm:$0xff]  ;;  %v5170_v8 = vpack.c.bf16 %v589_v63, %v585_v60 }
  0x5b   :  { %262 = vmatprep.mubr.f32.mxu0 %v4972_v0  ;;  %334 = vmatprep.mubr.f32.mxu1 %v4972_v0  ;;  %v5161_v3 = vld [vmem:[#allocation5 + $0x28] sm:$0xff]  ;;  %v5167_v5 = vpack.c.bf16 %v602_v62, %v598_v61  ;;  %v588_v7 = vld [vmem:[#allocation10 + $0xb0] sm:$0xff]  ;;  %v5172_v9 = vpack.c.bf16 %v611_v2, %v607_v1  ;;  %v606_v10 = vld [vmem:[#allocation10 + $0x140] sm:$0xff] }
  0x5c   :  { %3505 = vmatprep.subr.bf16.mxu0 %v5118_v38  ;;  %v610_v11 = vld [vmem:[#allocation10 + $0x160] sm:$0xff]  ;;  %v619_v14 = vld [vmem:[#allocation10 + $0x1a8] sm:$0xff]  ;;  %v593_v15 = vld [vmem:[#allocation10 + $0xd8] sm:$0xff]  ;;  %v5184_v18 = vpack.c.bf16 %v588_v7, %v584_v6 }
  0x5d   :  { %3507 = vmatpush1.bf16.msra.mxu0 %v5121_v39  ;;  %v597_v16 = vld [vmem:[#allocation10 + $0xf8] sm:$0xff]  ;;  %v5180_v17 = vld [vmem:[#allocation5 + $0x30] sm:$0xff]  ;;  %v5186_v21 = vpack.c.bf16 %v610_v11, %v606_v10  ;;  %v614_v22 = vld [vmem:[#allocation10 + $0x180] sm:$0xff] }
  0x5e   :  { %3406 = vmatmul.mubr.msk.f32.gmra.mrb[6].mxu0 %vm131_vm0, %v5129_v44  ;;  %3418 = vmatmul.mubr.msk.f32.gmra.mrb[6].mxu1 %vm131_vm0, %v5131_v45  ;;  %v618_v26 = vld [vmem:[#allocation10 + $0x1a0] sm:$0xff]  ;;  %v5192_v27 = vpack.c.bf16 %v597_v16, %v593_v15  ;;  %v592_v28 = vld [vmem:[#allocation10 + $0xd0] sm:$0xff]  ;;  %v623_v32 = vld [vmem:[#allocation10 + $0x1c8] sm:$0xff] }
  0x5f   :  { %268 = vmatprep.mubr.f32.mxu0 %v4972_v0  ;;  %405 = vmatprep.mubr.f32.mxu1 %v4972_v0  ;;  %v596_v29 = vld [vmem:[#allocation10 + $0xf0] sm:$0xff]  ;;  %v627_v33 = vld [vmem:[#allocation10 + $0x1e8] sm:$0xff]  ;;  %v601_v34 = vld [vmem:[#allocation10 + $0x118] sm:$0xff]  ;;  %v5204_v41 = vpack.c.bf16 %v618_v26, %v614_v22 }
  0x60   :  { %3509 = vmatprep.subr.bf16.mxu0 %v5134_v48  ;;  %v605_v37 = vld [vmem:[#allocation10 + $0x138] sm:$0xff]  ;;  %v5206_v42 = vpack.c.bf16 %v596_v29, %v592_v28  ;;  %v622_v43 = vld [vmem:[#allocation10 + $0x1c0] sm:$0xff]  ;;  %v600_v49 = vld [vmem:[#allocation10 + $0x110] sm:$0xff] }
  0x61   :  { %3511 = vmatpush1.bf16.msra.mxu0 %v5137_v51  ;;  %v5200_v40 = vld [vmem:[#allocation5 + $0x38] sm:$0xff]  ;;  %v626_v46 = vld [vmem:[#allocation10 + $0x1e0] sm:$0xff]  ;;  %v5212_v47 = vpack.c.bf16 %v605_v37, %v601_v34  ;;  %v604_v50 = vld [vmem:[#allocation10 + $0x130] sm:$0xff] }
  0x62   :  { %3407 = vmatmul.mubr.msk.f32.gmra.mrb[8].mxu0 %vm131_vm0, %v5145_v54  ;;  %3419 = vmatmul.mubr.msk.f32.vlgmr.msra.gmra.mrb[8].mxu1 %vm131_vm0, %v5080_v12  ;;  %v615_v12 = vld [vmem:[#allocation10 + $0x188] sm:$0xff]  ;;  %v609_v52 = vld [vmem:[#allocation10 + $0x158] sm:$0xff]  ;;  %v93_v57 = vld [vmem:[#allocation5 + $0x40] sm:$0xff]  ;;  %v5222_v58 = vpack.c.bf16 %v626_v46, %v622_v43  ;;  %v5224_v60 = vpack.c.bf16 %v604_v50, %v600_v49 }
  0x63   :  { %3531 = vmatpush1.bf16.msra.mxu1 %v5147_v55  ;;  %274 = vmatprep.mubr.f32.mxu0 %v4972_v0  ;;  %v613_v53 = vld [vmem:[#allocation10 + $0x178] sm:$0xff]  ;;  %v608_v61 = vld [vmem:[#allocation10 + $0x150] sm:$0xff]  ;;  %v94_v2 = vld [vmem:[#allocation5 + $0x48] sm:$0xff] }
  0x64   :  { %411 = vmatprep.mubr.f32.mxu1 %v4972_v0  ;;  %3533 = vmatprep.subr.bf16.mxu1 %v5149_v56  ;;  %v612_v62 = vld [vmem:[#allocation10 + $0x170] sm:$0xff]  ;;  %v617_v63 = vld [vmem:[#allocation10 + $0x198] sm:$0xff]  ;;  %v109_v49 = vld [vmem:[%s5978_s3] sm:$0xf] }
  0x65   :  { %3513 = vmatprep.subr.bf16.mxu0 %v5153_v59  ;;  %v621_v1 = vld [vmem:[#allocation10 + $0x1b8] sm:$0xff]  ;;  %v5237_v6 = vpack.c.bf16 %v612_v62, %v608_v61  ;;  %v616_v10 = vld [vmem:[#allocation10 + $0x190] sm:$0xff] }
  0x66   :  { %3408 = vmatmul.mubr.msk.f32.gmra.mrb[10].mxu0 %vm131_vm0, %v5161_v3  ;;  %3420 = vmatmul.mubr.msk.f32.gmra.mrb[10].mxu1 %vm131_vm0, %v5093_v23  ;;  %v5190_v23 = vpack.c.bf16 %v619_v14, %v615_v12  ;;  %v5240_v7 = vpack.c.bf16 %v621_v1, %v617_v63  ;;  %v620_v11 = vld [vmem:[#allocation10 + $0x1b0] sm:$0xff]  ;;  %v629_v12 = vld [vmem:[#allocation10 + $0x1f8] sm:$0xff] }
  0x67   :  { %280 = vmatprep.mubr.f32.mxu0 %v4972_v0  ;;  %417 = vmatprep.mubr.f32.mxu1 %v4972_v0  ;;  %v95_v14 = vld [vmem:[#allocation5 + $0x50] sm:$0xff]  ;;  %v5249_v15 = vpack.c.bf16 %v620_v11, %v616_v10 }
  0x68   :  { %3535 = vmatpush1.bf16.msra.mxu1 %v5165_v4  ;;  %3515 = vmatpush1.bf16.msra.mxu0 %v5167_v5  ;;  %v624_v22 = vld [vmem:[#allocation10 + $0x1d0] sm:$0xff] }
  0x69   :  { %3537 = vmatprep.subr.bf16.mxu1 %v5170_v8  ;;  %3517 = vmatprep.subr.bf16.mxu0 %v5172_v9  ;;  %v628_v26 = vld [vmem:[#allocation10 + $0x1f0] sm:$0xff] }
  0x6a   :  { %3409 = vmatmul.mubr.msk.f32.gmra.mrb[12].mxu0 %vm131_vm0, %v5180_v17  ;;  %3421 = vmatmul.mubr.msk.f32.gmra.mrb[12].mxu1 %vm131_vm0, %v5113_v35  ;;  %v5210_v35 = vpack.c.bf16 %v627_v33, %v623_v32  ;;  %v5260_v28 = vpack.c.bf16 %v628_v26, %v624_v22 }
  0x6b   :  { %286 = vmatprep.mubr.f32.mxu0 %v4972_v0  ;;  %423 = vmatprep.mubr.f32.mxu1 %v4972_v0 }
  0x6c   :  { %3539 = vmatpush1.bf16.msra.mxu1 %v5184_v18  ;;  %3519 = vmatpush1.bf16.msra.mxu0 %v5186_v21 }
  0x6d   :  { %3521 = vmatprep.subr.bf16.mxu0 %v5190_v23  ;;  %3541 = vmatprep.subr.bf16.mxu1 %v5192_v27 }
  0x6e   :  { %3410 = vmatmul.mubr.msk.f32.gmra.mrb[14].mxu0 %vm131_vm0, %v5200_v40  ;;  %3422 = vmatmul.mubr.msk.f32.gmra.mrb[14].mxu1 %vm131_vm0, %v5129_v44  ;;  %v5228_v44 = vpack.c.bf16 %v613_v53, %v609_v52 }
  0x6f   :  { %292 = vmatprep.mubr.f32.mxu0 %v4972_v0  ;;  %429 = vmatprep.mubr.f32.mxu1 %v4972_v0 }
  0x70   :  { %3523 = vmatpush1.bf16.msra.mxu0 %v5204_v41  ;;  %3543 = vmatpush1.bf16.msra.mxu1 %v5206_v42 }
  0x71   :  { %3525 = vmatprep.subr.bf16.mxu0 %v5210_v35  ;;  %3545 = vmatprep.subr.bf16.mxu1 %v5212_v47 }
  0x72   :  { %3411 = vmatmul.mubr.msk.f32.gmra.mrb[16].mxu0 %vm131_vm0, %v93_v57  ;;  %3423 = vmatmul.mubr.msk.f32.gmra.mrb[16].mxu1 %vm131_vm0, %v5145_v54  ;;  %v625_v54 = vld [vmem:[#allocation10 + $0x1d8] sm:$0xff] }
  0x73   :  { %298 = vmatprep.mubr.f32.mxu0 %v4972_v0  ;;  %435 = vmatprep.mubr.f32.mxu1 %v4972_v0  ;;  %v5252_v16 = vpack.c.bf16 %v629_v12, %v625_v54 }
  0x74   :  { %3527 = vmatpush1.bf16.msra.mxu0 %v5222_v58  ;;  %3547 = vmatpush1.bf16.msra.mxu1 %v5224_v60 }
  0x75   :  { %3549 = vmatprep.subr.bf16.mxu1 %v5228_v44  ;;  %3561 = vmatprep.subr.bf16.mxu0 %v5088_v19 }
  0x76   :  { %3412 = vmatmul.mubr.msk.f32.gmra.mrb[18].mxu0 %vm131_vm0, %v94_v2  ;;  %3424 = vmatmul.mubr.msk.f32.gmra.mrb[18].mxu1 %vm131_vm0, %v5161_v3  ;;  %v96_v3 = vld [vmem:[#allocation5 + $0x58] sm:$0xff] }
  0x77   :  { %304 = vmatprep.mubr.f32.mxu0 %v4972_v0  ;;  %441 = vmatprep.mubr.f32.mxu1 %v4972_v0 }
  0x78   :  { %3551 = vmatpush1.bf16.msra.mxu1 %v5237_v6 }
  0x79   :  { %3553 = vmatprep.subr.bf16.mxu1 %v5240_v7 }
  0x7a   :  { %3413 = vmatmul.mubr.msk.f32.gmra.mrb[20].mxu0 %vm131_vm0, %v95_v14  ;;  %3425 = vmatmul.mubr.msk.f32.gmra.mrb[20].mxu1 %vm131_vm0, %v5180_v17 }
  0x7b   :  { %310 = vmatprep.mubr.f32.mxu0 %v4972_v0  ;;  %447 = vmatprep.mubr.f32.mxu1 %v4972_v0 }
  0x7c   :  { %3555 = vmatpush1.bf16.msra.mxu1 %v5249_v15 }
  0x7d   :  { %3557 = vmatprep.subr.bf16.mxu1 %v5252_v16 }
  0x7e   :  { %3414 = vmatmul.mubr.msk.f32.gmra.mrb[22].mxu0 %vm131_vm0, %v96_v3  ;;  %3426 = vmatmul.mubr.msk.f32.gmra.mrb[22].mxu1 %vm131_vm0, %v5200_v40  ;;  %v111_v40 = vlaneseq }
  0x7f   :  { %453 = vmatprep.mubr.f32.mxu1 %v4972_v0  ;;  %700 = vmatprep.mubr.f32.mxu0 %v4972_v0 }
  0x80   :  { %3559 = vmatpush1.bf16.msra.mxu1 %v5260_v28  ;;  %v112_v43 = vshrl.u32 %v111_v40, 7 }
  0x81   :  { %3593 = vmatprep.subr.bf16.mxu1 %v5090_v20 }
  0x82   :  { %3427 = vmatmul.mubr.msk.f32.gmra.mrb[24].mxu1 %vm131_vm0, %v93_v57  ;;  %701 = vmatmul.mubr.f32.vlgmr.msra.gmra.mrb[0].mxu0 %v4972_v0  ;;  %v117_v46 = vsub.s32 1, %v112_v43  ;;  %v113_v50 = vsub.s32 0, %v112_v43  ;;  %v125_v62 = vsub.s32 3, %v112_v43  ;;  %v121_v1 = vsub.s32 2, %v112_v43 }
  0x83   :  { %459 = vmatprep.mubr.f32.mxu1 %v4972_v0  ;;  %3563 = vmatpush1.bf16.msra.mxu0 %v5097_v25 }
  0x84   :  { %3565 = vmatprep.subr.bf16.mxu0 %v5103_v30  ;;  %866 = vmatprep.mubr.f32.mxu0 %v4972_v0  ;;  %v5345_v52 = vrot.slane %v109_v49, %v117_v46  ;;  %v5347_v53 = vrot.slane %v109_v49, %v113_v50  ;;  %v5351_v63 = vrot.slane %v109_v49, %v125_v62 }
  0x85   :  { %v5354_v54 = vrot.slane %v109_v49, %v121_v1 }
  0x86   :  { %3428 = vmatmul.mubr.msk.f32.gmra.mrb[26].mxu1 %vm131_vm0, %v94_v2 }
  0x87   :  { %465 = vmatprep.mubr.f32.mxu1 %v4972_v0  ;;  %3567 = vmatpush1.bf16.msra.mxu0 %v5105_v31 }
  0x88   :  { %3569 = vmatprep.subr.bf16.mxu0 %v5118_v38 }
  0x8a   :  { %3429 = vmatmul.mubr.msk.f32.gmra.mrb[28].mxu1 %vm131_vm0, %v95_v14 }
  0x8b   :  { %471 = vmatprep.mubr.f32.mxu1 %v4972_v0  ;;  %3571 = vmatpush1.bf16.msra.mxu0 %v5121_v39 }
  0x8c   :  { %3573 = vmatprep.subr.bf16.mxu0 %v5134_v48 }
  0x8e   :  { %3430 = vmatmul.mubr.msk.f32.gmra.mrb[30].mxu1 %vm131_vm0, %v96_v3 }
  0x8f   :  { %477 = vmatprep.mubr.f32.mxu1 %v4972_v0  ;;  %3575 = vmatpush1.bf16.msra.mxu0 %v5137_v51 }
  0x90   :  { %3577 = vmatprep.subr.bf16.mxu0 %v5153_v59 }
  0x92   :  { %3431 = vmatmul.mubr.msk.f32.gmra.mrb[32].mxu1 %vm131_vm0, %v5082_v13 }
  0x93   :  { %483 = vmatprep.mubr.f32.mxu1 %v4972_v0  ;;  %3579 = vmatpush1.bf16.msra.mxu0 %v5167_v5 }
  0x94   :  { %3581 = vmatprep.subr.bf16.mxu0 %v5172_v9 }
  0x96   :  { %3432 = vmatmul.mubr.msk.f32.gmra.mrb[34].mxu1 %vm131_vm0, %v5095_v24 }
  0x97   :  { %489 = vmatprep.mubr.f32.mxu1 %v4972_v0  ;;  %3583 = vmatpush1.bf16.msra.mxu0 %v5186_v21 }
  0x98   :  { %3585 = vmatprep.subr.bf16.mxu0 %v5190_v23 }
  0x9a   :  { %3433 = vmatmul.mubr.msk.f32.gmra.mrb[36].mxu1 %vm131_vm0, %v5115_v36 }
  0x9b   :  { %495 = vmatprep.mubr.f32.mxu1 %v4972_v0  ;;  %3587 = vmatpush1.bf16.msra.mxu0 %v5204_v41 }
  0x9c   :  { %3589 = vmatprep.subr.bf16.mxu0 %v5210_v35 }
  0x9e   :  { %3434 = vmatmul.mubr.msk.f32.gmra.mrb[38].mxu1 %vm131_vm0, %v5131_v45 }
  0x9f   :  { %771 = vmatprep.mubr.f32.mxu1 %v4972_v0  ;;  %3591 = vmatpush1.bf16.msra.mxu0 %v5222_v58 }
  0xa0   :  { %3625 = vmatprep.subr.bf16.mxu0 %v5088_v19 }
  0xa2   :  { %772 = vmatmul.mubr.f32.vlgmr.msra.gmra.mrb[8].mxu1 %v4972_v0 }
  0xa3   :  { %3595 = vmatpush1.bf16.msra.mxu1 %v5147_v55  ;;  %937 = vmatprep.mubr.f32.mxu1 %v4972_v0 }
  0xa4   :  { %3597 = vmatprep.subr.bf16.mxu1 %v5149_v56 }
  0xa7   :  { %3599 = vmatpush1.bf16.msra.mxu1 %v5165_v4 }
  0xa8   :  { %3601 = vmatprep.subr.bf16.mxu1 %v5170_v8 }
  0xab   :  { %3603 = vmatpush1.bf16.msra.mxu1 %v5184_v18 }
  0xac   :  { %3605 = vmatprep.subr.bf16.mxu1 %v5192_v27 }
  0xaf   :  { %3607 = vmatpush1.bf16.msra.mxu1 %v5206_v42 }
  0xb0   :  { %3609 = vmatprep.subr.bf16.mxu1 %v5212_v47 }
  0xb3   :  { %3611 = vmatpush1.bf16.msra.mxu1 %v5224_v60 }
  0xb4   :  { %3613 = vmatprep.subr.bf16.mxu1 %v5228_v44 }
  0xb7   :  { %3615 = vmatpush1.bf16.msra.mxu1 %v5237_v6 }
  0xb8   :  { %3617 = vmatprep.subr.bf16.mxu1 %v5240_v7 }
  0xbb   :  { %3619 = vmatpush1.bf16.msra.mxu1 %v5249_v15 }
  0xbc   :  { %3621 = vmatprep.subr.bf16.mxu1 %v5252_v16 }
  0xbf   :  { %3623 = vmatpush1.bf16.msra.mxu1 %v5260_v28 }
  0xc0   :  { %3657 = vmatprep.subr.bf16.mxu1 %v5090_v20 }
 0x125   :  { %v5326_v13 = vpop.f32.mrb[0].mxu1 }
 0x126   :  { %v5328_v24 = vpop.f32.mrb[1].mxu1 }
 0x129   :  { %v5330_v36 = vpop.f32.mrb[2].mxu1 }
 0x12a   :  { %v5332_v45 = vpop.f32.mrb[3].mxu1 }
 0x12d   :  { %v5334_v17 = vpop.f32.mrb[4].mxu1 }
 0x12e   :  { %v5336_v29 = vpop.f32.mrb[5].mxu1 }
 0x131   :  { %v5338_v32 = vpop.f32.mrb[6].mxu1 }
 0x132   :  { %v5340_v33 = vpop.f32.mrb[7].mxu1 }
 0x155   :  { %v702_v34 = vpop.f32.mrb[0].mxu0 }
 0x156   :  { %v704_v37 = vpop.f32.mrb[1].mxu0  ;;  %v4546_v61 = vadd.f32 %v702_v34, %v5347_v53 }
 0x157   :  { %v4547_v57 = vadd.f32 %v704_v37, %v5345_v52 }
 0x159   :  { %4686 = vtanh.f32 %v4547_v57 }
 0x15a   :  { %4688 = vtanh.f32 %v4546_v61 }
 0x163   :  { %v4687_v12 = vpop.eup %4686 }
 0x164   :  { %v4689_v14 = vpop.eup %4688  ;;  %v786_v22 = vmul.f32 0.5, %v4687_v12 }
 0x165   :  { %v785_v3 = vmul.f32 0.5, %v4689_v14 }
 0x166   :  { %v789_v34 = vadd.f32 0.5, %v786_v22 }
 0x167   :  { %v788_v37 = vadd.f32 0.5, %v785_v3 }
 0x168   :  { %v792_v46 = vmul.f32 0.0, %v789_v34 }
 0x175   :  { %v773_v2 = vpop.f32.mrb[8].mxu1 }
 0x176   :  { %v775_v10 = vpop.f32.mrb[9].mxu1  ;;  %v4586_v26 = vadd.f32 %v773_v2, %v5354_v54 }
 0x177   :  { %v4587_v11 = vadd.f32 %v775_v10, %v5351_v63 }
 0x179   :  { %4690 = vtanh.f32 %v4587_v11 }
 0x17a   :  { %4692 = vtanh.f32 %v4586_v26 }
 0x183   :  { %v4691_v40 = vpop.eup %4690 }
 0x184   :  { %v793_v50 = vmul.f32 %v4691_v40, %v788_v37  ;;  %v4693_v57 = vpop.eup %4692 }
 0x185   :  { %v787_v49 = vmul.f32 0.5, %v4693_v57 }
 0x186   :  { %v5357_v43 = vadd.f32 %v793_v50, %v792_v46 }
 0x187   :  { %v790_v61 = vadd.f32 0.5, %v787_v49 }
 0x188   :  { %4694 = vtanh.f32 %v5357_v43 }
 0x192   :  { %v4695_v62 = vpop.eup %4694 }
 0x193   :  { %v796_v1 = vmul.f32 %v4695_v62, %v790_v61 }
 0x195   :  { %867 = vmatmul.mubr.f32.vlgmr.msra.gmra.mrb[2].mxu0 %v796_v1  ;;  %938 = vmatmul.mubr.f32.vlgmr.msra.gmra.mrb[10].mxu1 %v796_v1 }
 0x196   :  { %3627 = vmatpush1.bf16.msra.mxu0 %v5097_v25  ;;  %3659 = vmatpush1.bf16.msra.mxu1 %v5147_v55 }
 0x197   :  { %3629 = vmatprep.subr.bf16.mxu0 %v5103_v30  ;;  %3661 = vmatprep.subr.bf16.mxu1 %v5149_v56 }
 0x198   :  { %1032 = vmatprep.mubr.f32.mxu0 %v4972_v0  ;;  %1103 = vmatprep.mubr.f32.mxu1 %v4972_v0 }
 0x19a   :  { %3631 = vmatpush1.bf16.msra.mxu0 %v5105_v31  ;;  %3663 = vmatpush1.bf16.msra.mxu1 %v5165_v4 }
 0x19b   :  { %3633 = vmatprep.subr.bf16.mxu0 %v5118_v38  ;;  %3665 = vmatprep.subr.bf16.mxu1 %v5170_v8 }
 0x19e   :  { %3635 = vmatpush1.bf16.msra.mxu0 %v5121_v39  ;;  %3667 = vmatpush1.bf16.msra.mxu1 %v5184_v18 }
 0x19f   :  { %3637 = vmatprep.subr.bf16.mxu0 %v5134_v48  ;;  %3669 = vmatprep.subr.bf16.mxu1 %v5192_v27 }
 0x1a2   :  { %3639 = vmatpush1.bf16.msra.mxu0 %v5137_v51  ;;  %3671 = vmatpush1.bf16.msra.mxu1 %v5206_v42 }
 0x1a3   :  { %3641 = vmatprep.subr.bf16.mxu0 %v5153_v59  ;;  %3673 = vmatprep.subr.bf16.mxu1 %v5212_v47 }
 0x1a6   :  { %3643 = vmatpush1.bf16.msra.mxu0 %v5167_v5  ;;  %3675 = vmatpush1.bf16.msra.mxu1 %v5224_v60 }
 0x1a7   :  { %3645 = vmatprep.subr.bf16.mxu0 %v5172_v9  ;;  %3677 = vmatprep.subr.bf16.mxu1 %v5228_v44 }
 0x1aa   :  { %3647 = vmatpush1.bf16.msra.mxu0 %v5186_v21  ;;  %3679 = vmatpush1.bf16.msra.mxu1 %v5237_v6 }
 0x1ab   :  { %3649 = vmatprep.subr.bf16.mxu0 %v5190_v23  ;;  %3681 = vmatprep.subr.bf16.mxu1 %v5240_v7 }
 0x1ae   :  { %3651 = vmatpush1.bf16.msra.mxu0 %v5204_v41  ;;  %3683 = vmatpush1.bf16.msra.mxu1 %v5249_v15 }
 0x1af   :  { %3653 = vmatprep.subr.bf16.mxu0 %v5210_v35  ;;  %3685 = vmatprep.subr.bf16.mxu1 %v5252_v16 }
 0x1b2   :  { %3655 = vmatpush1.bf16.msra.mxu0 %v5222_v58  ;;  %3687 = vmatpush1.bf16.msra.mxu1 %v5260_v28 }
 0x1b3   :  { %3689 = vmatprep.subr.bf16.mxu0 %v5088_v19  ;;  %3721 = vmatprep.subr.bf16.mxu1 %v5090_v20 }
 0x268   :  { %v868_v2 = vpop.f32.mrb[2].mxu0  ;;  %v939_v10 = vpop.f32.mrb[10].mxu1 }
 0x269   :  { %v4548_v11 = vadd.f32 %v868_v2, %v5347_v53  ;;  %v870_v12 = vpop.f32.mrb[3].mxu0  ;;  %v941_v14 = vpop.f32.mrb[11].mxu1  ;;  %v4588_v3 = vadd.f32 %v939_v10, %v5354_v54 }
 0x26a   :  { %v4549_v22 = vadd.f32 %v870_v12, %v5345_v52  ;;  %v4589_v26 = vadd.f32 %v941_v14, %v5351_v63 }
 0x26b   :  { %4696 = vtanh.f32 %v4548_v11 }
 0x26c   :  { %4698 = vtanh.f32 %v4549_v22 }
 0x26d   :  { %4700 = vtanh.f32 %v4589_v26 }
 0x26e   :  { %4702 = vtanh.f32 %v4588_v3 }
 0x275   :  { %v4697_v34 = vpop.eup %4696 }
 0x276   :  { %v951_v37 = vmul.f32 0.5, %v4697_v34  ;;  %v4699_v40 = vpop.eup %4698 }
 0x277   :  { %v952_v50 = vmul.f32 0.5, %v4699_v40  ;;  %v4701_v57 = vpop.eup %4700 }
 0x278   :  { %v954_v46 = vadd.f32 0.5, %v951_v37  ;;  %v4703_v2 = vpop.eup %4702 }
 0x279   :  { %v955_v49 = vadd.f32 0.5, %v952_v50  ;;  %v953_v11 = vmul.f32 0.5, %v4703_v2 }
 0x27a   :  { %v959_v61 = vmul.f32 %v4701_v57, %v954_v46 }
 0x27b   :  { %v958_v62 = vmul.f32 %v955_v49, %v5357_v43  ;;  %v956_v12 = vadd.f32 0.5, %v953_v11 }
 0x27d   :  { %v5399_v1 = vadd.f32 %v959_v61, %v958_v62 }
 0x27f   :  { %4704 = vtanh.f32 %v5399_v1 }
 0x289   :  { %v4705_v14 = vpop.eup %4704 }
 0x28a   :  { %v962_v10 = vmul.f32 %v4705_v14, %v956_v12 }
 0x28c   :  { %1033 = vmatmul.mubr.f32.vlgmr.msra.gmra.mrb[4].mxu0 %v962_v10  ;;  %1104 = vmatmul.mubr.f32.vlgmr.msra.gmra.mrb[12].mxu1 %v962_v10 }
 0x28d   :  { %3691 = vmatpush1.bf16.msra.mxu0 %v5097_v25  ;;  %3723 = vmatpush1.bf16.msra.mxu1 %v5147_v55 }
 0x28e   :  { %3693 = vmatprep.subr.bf16.mxu0 %v5103_v30  ;;  %3725 = vmatprep.subr.bf16.mxu1 %v5149_v56 }
 0x28f   :  { %1198 = vmatprep.mubr.f32.mxu0 %v4972_v0  ;;  %1269 = vmatprep.mubr.f32.mxu1 %v4972_v0 }
 0x291   :  { %3695 = vmatpush1.bf16.msra.mxu0 %v5105_v31  ;;  %3727 = vmatpush1.bf16.msra.mxu1 %v5165_v4 }
 0x292   :  { %3697 = vmatprep.subr.bf16.mxu0 %v5118_v38  ;;  %3729 = vmatprep.subr.bf16.mxu1 %v5170_v8 }
 0x295   :  { %3699 = vmatpush1.bf16.msra.mxu0 %v5121_v39  ;;  %3731 = vmatpush1.bf16.msra.mxu1 %v5184_v18 }
 0x296   :  { %3701 = vmatprep.subr.bf16.mxu0 %v5134_v48  ;;  %3733 = vmatprep.subr.bf16.mxu1 %v5192_v27 }
 0x299   :  { %3703 = vmatpush1.bf16.msra.mxu0 %v5137_v51  ;;  %3735 = vmatpush1.bf16.msra.mxu1 %v5206_v42 }
 0x29a   :  { %3705 = vmatprep.subr.bf16.mxu0 %v5153_v59  ;;  %3737 = vmatprep.subr.bf16.mxu1 %v5212_v47 }
 0x29d   :  { %3707 = vmatpush1.bf16.msra.mxu0 %v5167_v5  ;;  %3739 = vmatpush1.bf16.msra.mxu1 %v5224_v60 }
 0x29e   :  { %3709 = vmatprep.subr.bf16.mxu0 %v5172_v9  ;;  %3741 = vmatprep.subr.bf16.mxu1 %v5228_v44 }
 0x2a1   :  { %3711 = vmatpush1.bf16.msra.mxu0 %v5186_v21  ;;  %3743 = vmatpush1.bf16.msra.mxu1 %v5237_v6 }
 0x2a2   :  { %3713 = vmatprep.subr.bf16.mxu0 %v5190_v23  ;;  %3745 = vmatprep.subr.bf16.mxu1 %v5240_v7 }
 0x2a5   :  { %3715 = vmatpush1.bf16.msra.mxu0 %v5204_v41  ;;  %3747 = vmatpush1.bf16.msra.mxu1 %v5249_v15 }
 0x2a6   :  { %3717 = vmatprep.subr.bf16.mxu0 %v5210_v35  ;;  %3749 = vmatprep.subr.bf16.mxu1 %v5252_v16 }
 0x2a9   :  { %3719 = vmatpush1.bf16.msra.mxu0 %v5222_v58  ;;  %3751 = vmatpush1.bf16.msra.mxu1 %v5260_v28 }
 0x2aa   :  { %3753 = vmatprep.subr.bf16.mxu0 %v5088_v19  ;;  %3785 = vmatprep.subr.bf16.mxu1 %v5090_v20 }
 0x35f   :  { %v1034_v43 = vpop.f32.mrb[4].mxu0  ;;  %v1105_v22 = vpop.f32.mrb[12].mxu1 }
 0x360   :  { %v4550_v26 = vadd.f32 %v1034_v43, %v5347_v53  ;;  %v1036_v3 = vpop.f32.mrb[5].mxu0  ;;  %v1107_v34 = vpop.f32.mrb[13].mxu1  ;;  %v4590_v46 = vadd.f32 %v1105_v22, %v5354_v54 }
 0x361   :  { %v4551_v37 = vadd.f32 %v1036_v3, %v5345_v52  ;;  %v4591_v40 = vadd.f32 %v1107_v34, %v5351_v63 }
 0x362   :  { %4706 = vtanh.f32 %v4550_v26 }
 0x363   :  { %4708 = vtanh.f32 %v4551_v37 }
 0x364   :  { %4710 = vtanh.f32 %v4591_v40 }
 0x365   :  { %4712 = vtanh.f32 %v4590_v46 }
 0x36c   :  { %v4707_v50 = vpop.eup %4706 }
 0x36d   :  { %v1117_v57 = vmul.f32 0.5, %v4707_v50  ;;  %v4709_v49 = vpop.eup %4708 }
 0x36e   :  { %v1118_v62 = vmul.f32 0.5, %v4709_v49  ;;  %v4711_v2 = vpop.eup %4710 }
 0x36f   :  { %v1120_v61 = vadd.f32 0.5, %v1117_v57  ;;  %v4713_v43 = vpop.eup %4712 }
 0x370   :  { %v1121_v11 = vadd.f32 0.5, %v1118_v62  ;;  %v1119_v26 = vmul.f32 0.5, %v4713_v43 }
 0x371   :  { %v1125_v12 = vmul.f32 %v4711_v2, %v1120_v61 }
 0x372   :  { %v1124_v14 = vmul.f32 %v1121_v11, %v5399_v1  ;;  %v1122_v3 = vadd.f32 0.5, %v1119_v26 }
 0x374   :  { %v5441_v10 = vadd.f32 %v1125_v12, %v1124_v14 }
 0x376   :  { %4714 = vtanh.f32 %v5441_v10 }
 0x380   :  { %v4715_v34 = vpop.eup %4714 }
 0x381   :  { %v1128_v22 = vmul.f32 %v4715_v34, %v1122_v3 }
 0x383   :  { %1199 = vmatmul.mubr.f32.vlgmr.msra.gmra.mrb[6].mxu0 %v1128_v22  ;;  %1270 = vmatmul.mubr.f32.vlgmr.msra.gmra.mrb[14].mxu1 %v1128_v22 }
 0x384   :  { %3755 = vmatpush1.bf16.msra.mxu0 %v5097_v25  ;;  %3787 = vmatpush1.bf16.msra.mxu1 %v5147_v55 }
 0x385   :  { %3757 = vmatprep.subr.bf16.mxu0 %v5103_v30  ;;  %3789 = vmatprep.subr.bf16.mxu1 %v5149_v56 }
 0x386   :  { %1364 = vmatprep.mubr.f32.mxu0 %v4972_v0  ;;  %1435 = vmatprep.mubr.f32.mxu1 %v4972_v0 }
 0x388   :  { %3759 = vmatpush1.bf16.msra.mxu0 %v5105_v31  ;;  %3791 = vmatpush1.bf16.msra.mxu1 %v5165_v4 }
 0x389   :  { %3761 = vmatprep.subr.bf16.mxu0 %v5118_v38  ;;  %3793 = vmatprep.subr.bf16.mxu1 %v5170_v8 }
 0x38c   :  { %3763 = vmatpush1.bf16.msra.mxu0 %v5121_v39  ;;  %3795 = vmatpush1.bf16.msra.mxu1 %v5184_v18 }
 0x38d   :  { %3765 = vmatprep.subr.bf16.mxu0 %v5134_v48  ;;  %3797 = vmatprep.subr.bf16.mxu1 %v5192_v27 }
 0x390   :  { %3767 = vmatpush1.bf16.msra.mxu0 %v5137_v51  ;;  %3799 = vmatpush1.bf16.msra.mxu1 %v5206_v42 }
 0x391   :  { %3769 = vmatprep.subr.bf16.mxu0 %v5153_v59  ;;  %3801 = vmatprep.subr.bf16.mxu1 %v5212_v47 }
 0x394   :  { %3771 = vmatpush1.bf16.msra.mxu0 %v5167_v5  ;;  %3803 = vmatpush1.bf16.msra.mxu1 %v5224_v60 }
 0x395   :  { %3773 = vmatprep.subr.bf16.mxu0 %v5172_v9  ;;  %3805 = vmatprep.subr.bf16.mxu1 %v5228_v44 }
 0x398   :  { %3775 = vmatpush1.bf16.msra.mxu0 %v5186_v21  ;;  %3807 = vmatpush1.bf16.msra.mxu1 %v5237_v6 }
 0x399   :  { %3777 = vmatprep.subr.bf16.mxu0 %v5190_v23  ;;  %3809 = vmatprep.subr.bf16.mxu1 %v5240_v7 }
 0x39c   :  { %3779 = vmatpush1.bf16.msra.mxu0 %v5204_v41  ;;  %3811 = vmatpush1.bf16.msra.mxu1 %v5249_v15 }
 0x39d   :  { %3781 = vmatprep.subr.bf16.mxu0 %v5210_v35  ;;  %3813 = vmatprep.subr.bf16.mxu1 %v5252_v16 }
 0x3a0   :  { %3783 = vmatpush1.bf16.msra.mxu0 %v5222_v58  ;;  %3815 = vmatpush1.bf16.msra.mxu1 %v5260_v28 }
 0x3a1   :  { %3817 = vmatprep.subr.bf16.mxu0 %v5088_v19  ;;  %3849 = vmatprep.subr.bf16.mxu1 %v5090_v20 }
 0x456   :  { %v1200_v1 = vpop.f32.mrb[6].mxu0  ;;  %v1271_v37 = vpop.f32.mrb[14].mxu1 }
 0x457   :  { %v4552_v40 = vadd.f32 %v1200_v1, %v5347_v53  ;;  %v1202_v46 = vpop.f32.mrb[7].mxu0  ;;  %v1273_v50 = vpop.f32.mrb[15].mxu1  ;;  %v4592_v61 = vadd.f32 %v1271_v37, %v5354_v54 }
 0x458   :  { %v4553_v57 = vadd.f32 %v1202_v46, %v5345_v52  ;;  %v4593_v49 = vadd.f32 %v1273_v50, %v5351_v63 }
 0x459   :  { %4716 = vtanh.f32 %v4552_v40 }
 0x45a   :  { %4718 = vtanh.f32 %v4553_v57 }
 0x45b   :  { %4720 = vtanh.f32 %v4593_v49 }
 0x45c   :  { %4722 = vtanh.f32 %v4592_v61 }
 0x463   :  { %v4717_v62 = vpop.eup %4716 }
 0x464   :  { %v1283_v2 = vmul.f32 0.5, %v4717_v62  ;;  %v4719_v11 = vpop.eup %4718 }
 0x465   :  { %v1284_v14 = vmul.f32 0.5, %v4719_v11  ;;  %v4721_v43 = vpop.eup %4720 }
 0x466   :  { %v1286_v12 = vadd.f32 0.5, %v1283_v2  ;;  %v4723_v1 = vpop.eup %4722 }
 0x467   :  { %v1287_v26 = vadd.f32 0.5, %v1284_v14  ;;  %v1285_v40 = vmul.f32 0.5, %v4723_v1 }
 0x468   :  { %v1291_v3 = vmul.f32 %v4721_v43, %v1286_v12 }
 0x469   :  { %v1290_v34 = vmul.f32 %v1287_v26, %v5441_v10  ;;  %v1288_v46 = vadd.f32 0.5, %v1285_v40 }
 0x46b   :  { %v5483_v22 = vadd.f32 %v1291_v3, %v1290_v34 }
 0x46d   :  { %4724 = vtanh.f32 %v5483_v22 }
 0x477   :  { %v4725_v50 = vpop.eup %4724 }
 0x478   :  { %v1294_v37 = vmul.f32 %v4725_v50, %v1288_v46 }
 0x47a   :  { %1365 = vmatmul.mubr.f32.vlgmr.msra.gmra.mrb[8].mxu0 %v1294_v37  ;;  %1436 = vmatmul.mubr.f32.vlgmr.msra.gmra.mrb[16].mxu1 %v1294_v37 }
 0x47b   :  { %3819 = vmatpush1.bf16.msra.mxu0 %v5097_v25  ;;  %3851 = vmatpush1.bf16.msra.mxu1 %v5147_v55 }
 0x47c   :  { %3821 = vmatprep.subr.bf16.mxu0 %v5103_v30  ;;  %3853 = vmatprep.subr.bf16.mxu1 %v5149_v56 }
 0x47d   :  { %1530 = vmatprep.mubr.f32.mxu0 %v4972_v0  ;;  %1601 = vmatprep.mubr.f32.mxu1 %v4972_v0 }
 0x47f   :  { %3823 = vmatpush1.bf16.msra.mxu0 %v5105_v31  ;;  %3855 = vmatpush1.bf16.msra.mxu1 %v5165_v4 }
 0x480   :  { %3825 = vmatprep.subr.bf16.mxu0 %v5118_v38  ;;  %3857 = vmatprep.subr.bf16.mxu1 %v5170_v8 }
 0x483   :  { %3827 = vmatpush1.bf16.msra.mxu0 %v5121_v39  ;;  %3859 = vmatpush1.bf16.msra.mxu1 %v5184_v18 }
 0x484   :  { %3829 = vmatprep.subr.bf16.mxu0 %v5134_v48  ;;  %3861 = vmatprep.subr.bf16.mxu1 %v5192_v27 }
 0x487   :  { %3831 = vmatpush1.bf16.msra.mxu0 %v5137_v51  ;;  %3863 = vmatpush1.bf16.msra.mxu1 %v5206_v42 }
 0x488   :  { %3833 = vmatprep.subr.bf16.mxu0 %v5153_v59  ;;  %3865 = vmatprep.subr.bf16.mxu1 %v5212_v47 }
 0x48b   :  { %3835 = vmatpush1.bf16.msra.mxu0 %v5167_v5  ;;  %3867 = vmatpush1.bf16.msra.mxu1 %v5224_v60 }
 0x48c   :  { %3837 = vmatprep.subr.bf16.mxu0 %v5172_v9  ;;  %3869 = vmatprep.subr.bf16.mxu1 %v5228_v44 }
 0x48f   :  { %3839 = vmatpush1.bf16.msra.mxu0 %v5186_v21  ;;  %3871 = vmatpush1.bf16.msra.mxu1 %v5237_v6 }
 0x490   :  { %3841 = vmatprep.subr.bf16.mxu0 %v5190_v23  ;;  %3873 = vmatprep.subr.bf16.mxu1 %v5240_v7 }
 0x493   :  { %3843 = vmatpush1.bf16.msra.mxu0 %v5204_v41  ;;  %3875 = vmatpush1.bf16.msra.mxu1 %v5249_v15 }
 0x494   :  { %3845 = vmatprep.subr.bf16.mxu0 %v5210_v35  ;;  %3877 = vmatprep.subr.bf16.mxu1 %v5252_v16 }
 0x497   :  { %3847 = vmatpush1.bf16.msra.mxu0 %v5222_v58  ;;  %3879 = vmatpush1.bf16.msra.mxu1 %v5260_v28 }
 0x498   :  { %3881 = vmatprep.subr.bf16.mxu0 %v5088_v19  ;;  %3913 = vmatprep.subr.bf16.mxu1 %v5090_v20 }
 0x54d   :  { %v1366_v10 = vpop.f32.mrb[8].mxu0  ;;  %v1437_v57 = vpop.f32.mrb[16].mxu1 }
 0x54e   :  { %v4554_v49 = vadd.f32 %v1366_v10, %v5347_v53  ;;  %v1368_v61 = vpop.f32.mrb[9].mxu0  ;;  %v1439_v62 = vpop.f32.mrb[17].mxu1  ;;  %v4594_v12 = vadd.f32 %v1437_v57, %v5354_v54 }
 0x54f   :  { %v4555_v2 = vadd.f32 %v1368_v61, %v5345_v52  ;;  %v4595_v11 = vadd.f32 %v1439_v62, %v5351_v63 }
 0x550   :  { %4726 = vtanh.f32 %v4554_v49 }
 0x551   :  { %4728 = vtanh.f32 %v4555_v2 }
 0x552   :  { %4730 = vtanh.f32 %v4595_v11 }
 0x553   :  { %4732 = vtanh.f32 %v4594_v12 }
 0x55a   :  { %v4727_v14 = vpop.eup %4726 }
 0x55b   :  { %v1449_v43 = vmul.f32 0.5, %v4727_v14  ;;  %v4729_v26 = vpop.eup %4728 }
 0x55c   :  { %v1450_v34 = vmul.f32 0.5, %v4729_v26  ;;  %v4731_v1 = vpop.eup %4730 }
 0x55d   :  { %v1452_v3 = vadd.f32 0.5, %v1449_v43  ;;  %v4733_v10 = vpop.eup %4732 }
 0x55e   :  { %v1453_v40 = vadd.f32 0.5, %v1450_v34  ;;  %v1451_v49 = vmul.f32 0.5, %v4733_v10 }
 0x55f   :  { %v1457_v46 = vmul.f32 %v4731_v1, %v1452_v3 }
 0x560   :  { %v1456_v50 = vmul.f32 %v1453_v40, %v5483_v22  ;;  %v1454_v61 = vadd.f32 0.5, %v1451_v49 }
 0x562   :  { %v5525_v37 = vadd.f32 %v1457_v46, %v1456_v50 }
 0x564   :  { %4734 = vtanh.f32 %v5525_v37 }
 0x56e   :  { %v4735_v62 = vpop.eup %4734 }
 0x56f   :  { %v1460_v57 = vmul.f32 %v4735_v62, %v1454_v61 }
 0x571   :  { %1531 = vmatmul.mubr.f32.vlgmr.msra.gmra.mrb[10].mxu0 %v1460_v57  ;;  %1602 = vmatmul.mubr.f32.vlgmr.msra.gmra.mrb[18].mxu1 %v1460_v57 }
 0x572   :  { %3883 = vmatpush1.bf16.msra.mxu0 %v5097_v25  ;;  %3915 = vmatpush1.bf16.msra.mxu1 %v5147_v55 }
 0x573   :  { %3885 = vmatprep.subr.bf16.mxu0 %v5103_v30  ;;  %3917 = vmatprep.subr.bf16.mxu1 %v5149_v56 }
 0x574   :  { %1696 = vmatprep.mubr.f32.mxu0 %v4972_v0  ;;  %1767 = vmatprep.mubr.f32.mxu1 %v4972_v0 }
 0x576   :  { %3887 = vmatpush1.bf16.msra.mxu0 %v5105_v31  ;;  %3919 = vmatpush1.bf16.msra.mxu1 %v5165_v4 }
 0x577   :  { %3889 = vmatprep.subr.bf16.mxu0 %v5118_v38  ;;  %3921 = vmatprep.subr.bf16.mxu1 %v5170_v8 }
 0x57a   :  { %3891 = vmatpush1.bf16.msra.mxu0 %v5121_v39  ;;  %3923 = vmatpush1.bf16.msra.mxu1 %v5184_v18 }
 0x57b   :  { %3893 = vmatprep.subr.bf16.mxu0 %v5134_v48  ;;  %3925 = vmatprep.subr.bf16.mxu1 %v5192_v27 }
 0x57e   :  { %3895 = vmatpush1.bf16.msra.mxu0 %v5137_v51  ;;  %3927 = vmatpush1.bf16.msra.mxu1 %v5206_v42 }
 0x57f   :  { %3897 = vmatprep.subr.bf16.mxu0 %v5153_v59  ;;  %3929 = vmatprep.subr.bf16.mxu1 %v5212_v47 }
 0x582   :  { %3899 = vmatpush1.bf16.msra.mxu0 %v5167_v5  ;;  %3931 = vmatpush1.bf16.msra.mxu1 %v5224_v60 }
 0x583   :  { %3901 = vmatprep.subr.bf16.mxu0 %v5172_v9  ;;  %3933 = vmatprep.subr.bf16.mxu1 %v5228_v44 }
 0x586   :  { %3903 = vmatpush1.bf16.msra.mxu0 %v5186_v21  ;;  %3935 = vmatpush1.bf16.msra.mxu1 %v5237_v6 }
 0x587   :  { %3905 = vmatprep.subr.bf16.mxu0 %v5190_v23  ;;  %3937 = vmatprep.subr.bf16.mxu1 %v5240_v7 }
 0x58a   :  { %3907 = vmatpush1.bf16.msra.mxu0 %v5204_v41  ;;  %3939 = vmatpush1.bf16.msra.mxu1 %v5249_v15 }
 0x58b   :  { %3909 = vmatprep.subr.bf16.mxu0 %v5210_v35  ;;  %3941 = vmatprep.subr.bf16.mxu1 %v5252_v16 }
 0x58e   :  { %3911 = vmatpush1.bf16.msra.mxu0 %v5222_v58  ;;  %3943 = vmatpush1.bf16.msra.mxu1 %v5260_v28 }
 0x58f   :  { %3945 = vmatprep.subr.bf16.mxu0 %v5088_v19  ;;  %3977 = vmatprep.subr.bf16.mxu1 %v5090_v20 }
 0x644   :  { %v1532_v22 = vpop.f32.mrb[10].mxu0  ;;  %v1603_v2 = vpop.f32.mrb[18].mxu1 }
 0x645   :  { %v4556_v11 = vadd.f32 %v1532_v22, %v5347_v53  ;;  %v1534_v12 = vpop.f32.mrb[11].mxu0  ;;  %v1605_v14 = vpop.f32.mrb[19].mxu1  ;;  %v4596_v3 = vadd.f32 %v1603_v2, %v5354_v54 }
 0x646   :  { %v4557_v43 = vadd.f32 %v1534_v12, %v5345_v52  ;;  %v4597_v26 = vadd.f32 %v1605_v14, %v5351_v63 }
 0x647   :  { %4736 = vtanh.f32 %v4556_v11 }
 0x648   :  { %4738 = vtanh.f32 %v4557_v43 }
 0x649   :  { %4740 = vtanh.f32 %v4597_v26 }
 0x64a   :  { %4742 = vtanh.f32 %v4596_v3 }
 0x651   :  { %v4737_v34 = vpop.eup %4736 }
 0x652   :  { %v1615_v1 = vmul.f32 0.5, %v4737_v34  ;;  %v4739_v40 = vpop.eup %4738 }
 0x653   :  { %v1616_v50 = vmul.f32 0.5, %v4739_v40  ;;  %v4741_v10 = vpop.eup %4740 }
 0x654   :  { %v1618_v46 = vadd.f32 0.5, %v1615_v1  ;;  %v4743_v22 = vpop.eup %4742 }
 0x655   :  { %v1619_v49 = vadd.f32 0.5, %v1616_v50  ;;  %v1617_v11 = vmul.f32 0.5, %v4743_v22 }
 0x656   :  { %v1623_v61 = vmul.f32 %v4741_v10, %v1618_v46 }
 0x657   :  { %v1622_v62 = vmul.f32 %v1619_v49, %v5525_v37  ;;  %v1620_v12 = vadd.f32 0.5, %v1617_v11 }
 0x659   :  { %v5567_v57 = vadd.f32 %v1623_v61, %v1622_v62 }
 0x65b   :  { %4744 = vtanh.f32 %v5567_v57 }
 0x665   :  { %v4745_v14 = vpop.eup %4744 }
 0x666   :  { %v1626_v2 = vmul.f32 %v4745_v14, %v1620_v12 }
 0x668   :  { %1697 = vmatmul.mubr.f32.vlgmr.msra.gmra.mrb[12].mxu0 %v1626_v2  ;;  %1768 = vmatmul.mubr.f32.vlgmr.msra.gmra.mrb[20].mxu1 %v1626_v2 }
 0x669   :  { %3947 = vmatpush1.bf16.msra.mxu0 %v5097_v25  ;;  %3979 = vmatpush1.bf16.msra.mxu1 %v5147_v55 }
 0x66a   :  { %3949 = vmatprep.subr.bf16.mxu0 %v5103_v30  ;;  %3981 = vmatprep.subr.bf16.mxu1 %v5149_v56 }
 0x66b   :  { %1862 = vmatprep.mubr.f32.mxu0 %v4972_v0  ;;  %1933 = vmatprep.mubr.f32.mxu1 %v4972_v0 }
 0x66d   :  { %3951 = vmatpush1.bf16.msra.mxu0 %v5105_v31  ;;  %3983 = vmatpush1.bf16.msra.mxu1 %v5165_v4 }
 0x66e   :  { %3953 = vmatprep.subr.bf16.mxu0 %v5118_v38  ;;  %3985 = vmatprep.subr.bf16.mxu1 %v5170_v8 }
 0x671   :  { %3955 = vmatpush1.bf16.msra.mxu0 %v5121_v39  ;;  %3987 = vmatpush1.bf16.msra.mxu1 %v5184_v18 }
 0x672   :  { %3957 = vmatprep.subr.bf16.mxu0 %v5134_v48  ;;  %3989 = vmatprep.subr.bf16.mxu1 %v5192_v27 }
 0x675   :  { %3959 = vmatpush1.bf16.msra.mxu0 %v5137_v51  ;;  %3991 = vmatpush1.bf16.msra.mxu1 %v5206_v42 }
 0x676   :  { %3961 = vmatprep.subr.bf16.mxu0 %v5153_v59  ;;  %3993 = vmatprep.subr.bf16.mxu1 %v5212_v47 }
 0x679   :  { %3963 = vmatpush1.bf16.msra.mxu0 %v5167_v5  ;;  %3995 = vmatpush1.bf16.msra.mxu1 %v5224_v60 }
 0x67a   :  { %3965 = vmatprep.subr.bf16.mxu0 %v5172_v9  ;;  %3997 = vmatprep.subr.bf16.mxu1 %v5228_v44 }
 0x67d   :  { %3967 = vmatpush1.bf16.msra.mxu0 %v5186_v21  ;;  %3999 = vmatpush1.bf16.msra.mxu1 %v5237_v6 }
 0x67e   :  { %3969 = vmatprep.subr.bf16.mxu0 %v5190_v23  ;;  %4001 = vmatprep.subr.bf16.mxu1 %v5240_v7 }
 0x681   :  { %3971 = vmatpush1.bf16.msra.mxu0 %v5204_v41  ;;  %4003 = vmatpush1.bf16.msra.mxu1 %v5249_v15 }
 0x682   :  { %3973 = vmatprep.subr.bf16.mxu0 %v5210_v35  ;;  %4005 = vmatprep.subr.bf16.mxu1 %v5252_v16 }
 0x685   :  { %3975 = vmatpush1.bf16.msra.mxu0 %v5222_v58  ;;  %4007 = vmatpush1.bf16.msra.mxu1 %v5260_v28 }
 0x686   :  { %4009 = vmatprep.subr.bf16.mxu0 %v5088_v19  ;;  %4041 = vmatprep.subr.bf16.mxu1 %v5090_v20 }
 0x73b   :  { %v1698_v37 = vpop.f32.mrb[12].mxu0  ;;  %v1769_v43 = vpop.f32.mrb[20].mxu1 }
 0x73c   :  { %v4558_v26 = vadd.f32 %v1698_v37, %v5347_v53  ;;  %v1700_v3 = vpop.f32.mrb[13].mxu0  ;;  %v1771_v34 = vpop.f32.mrb[21].mxu1  ;;  %v4598_v46 = vadd.f32 %v1769_v43, %v5354_v54 }
 0x73d   :  { %v4559_v1 = vadd.f32 %v1700_v3, %v5345_v52  ;;  %v4599_v40 = vadd.f32 %v1771_v34, %v5351_v63 }
 0x73e   :  { %4746 = vtanh.f32 %v4558_v26 }
 0x73f   :  { %4748 = vtanh.f32 %v4559_v1 }
 0x740   :  { %4750 = vtanh.f32 %v4599_v40 }
 0x741   :  { %4752 = vtanh.f32 %v4598_v46 }
 0x748   :  { %v4747_v50 = vpop.eup %4746 }
 0x749   :  { %v1781_v10 = vmul.f32 0.5, %v4747_v50  ;;  %v4749_v49 = vpop.eup %4748 }
 0x74a   :  { %v1782_v62 = vmul.f32 0.5, %v4749_v49  ;;  %v4751_v22 = vpop.eup %4750 }
 0x74b   :  { %v1784_v61 = vadd.f32 0.5, %v1781_v10  ;;  %v4753_v37 = vpop.eup %4752 }
 0x74c   :  { %v1785_v11 = vadd.f32 0.5, %v1782_v62  ;;  %v1783_v26 = vmul.f32 0.5, %v4753_v37 }
 0x74d   :  { %v1789_v12 = vmul.f32 %v4751_v22, %v1784_v61 }
 0x74e   :  { %v1788_v14 = vmul.f32 %v1785_v11, %v5567_v57  ;;  %v1786_v3 = vadd.f32 0.5, %v1783_v26 }
 0x750   :  { %v5609_v2 = vadd.f32 %v1789_v12, %v1788_v14 }
 0x752   :  { %4754 = vtanh.f32 %v5609_v2 }
 0x75c   :  { %v4755_v34 = vpop.eup %4754 }
 0x75d   :  { %v1792_v43 = vmul.f32 %v4755_v34, %v1786_v3 }
 0x75f   :  { %1863 = vmatmul.mubr.f32.vlgmr.msra.gmra.mrb[14].mxu0 %v1792_v43  ;;  %1934 = vmatmul.mubr.f32.vlgmr.msra.gmra.mrb[22].mxu1 %v1792_v43 }
 0x760   :  { %4011 = vmatpush1.bf16.msra.mxu0 %v5097_v25  ;;  %4043 = vmatpush1.bf16.msra.mxu1 %v5147_v55 }
 0x761   :  { %4013 = vmatprep.subr.bf16.mxu0 %v5103_v30  ;;  %4045 = vmatprep.subr.bf16.mxu1 %v5149_v56 }
 0x762   :  { %2028 = vmatprep.mubr.f32.mxu0 %v4972_v0  ;;  %2099 = vmatprep.mubr.f32.mxu1 %v4972_v0 }
 0x764   :  { %4015 = vmatpush1.bf16.msra.mxu0 %v5105_v31  ;;  %4047 = vmatpush1.bf16.msra.mxu1 %v5165_v4 }
 0x765   :  { %4017 = vmatprep.subr.bf16.mxu0 %v5118_v38  ;;  %4049 = vmatprep.subr.bf16.mxu1 %v5170_v8 }
 0x768   :  { %4019 = vmatpush1.bf16.msra.mxu0 %v5121_v39  ;;  %4051 = vmatpush1.bf16.msra.mxu1 %v5184_v18 }
 0x769   :  { %4021 = vmatprep.subr.bf16.mxu0 %v5134_v48  ;;  %4053 = vmatprep.subr.bf16.mxu1 %v5192_v27 }
 0x76c   :  { %4023 = vmatpush1.bf16.msra.mxu0 %v5137_v51  ;;  %4055 = vmatpush1.bf16.msra.mxu1 %v5206_v42 }
 0x76d   :  { %4025 = vmatprep.subr.bf16.mxu0 %v5153_v59  ;;  %4057 = vmatprep.subr.bf16.mxu1 %v5212_v47 }
 0x770   :  { %4027 = vmatpush1.bf16.msra.mxu0 %v5167_v5  ;;  %4059 = vmatpush1.bf16.msra.mxu1 %v5224_v60 }
 0x771   :  { %4029 = vmatprep.subr.bf16.mxu0 %v5172_v9  ;;  %4061 = vmatprep.subr.bf16.mxu1 %v5228_v44 }
 0x774   :  { %4031 = vmatpush1.bf16.msra.mxu0 %v5186_v21  ;;  %4063 = vmatpush1.bf16.msra.mxu1 %v5237_v6 }
 0x775   :  { %4033 = vmatprep.subr.bf16.mxu0 %v5190_v23  ;;  %4065 = vmatprep.subr.bf16.mxu1 %v5240_v7 }
 0x778   :  { %4035 = vmatpush1.bf16.msra.mxu0 %v5204_v41  ;;  %4067 = vmatpush1.bf16.msra.mxu1 %v5249_v15 }
 0x779   :  { %4037 = vmatprep.subr.bf16.mxu0 %v5210_v35  ;;  %4069 = vmatprep.subr.bf16.mxu1 %v5252_v16 }
 0x77c   :  { %4039 = vmatpush1.bf16.msra.mxu0 %v5222_v58  ;;  %4071 = vmatpush1.bf16.msra.mxu1 %v5260_v28 }
 0x77d   :  { %4073 = vmatprep.subr.bf16.mxu0 %v5088_v19  ;;  %4105 = vmatprep.subr.bf16.mxu1 %v5090_v20 }
 0x832   :  { %v1864_v57 = vpop.f32.mrb[14].mxu0  ;;  %v1935_v1 = vpop.f32.mrb[22].mxu1 }
 0x833   :  { %v4560_v40 = vadd.f32 %v1864_v57, %v5347_v53  ;;  %v1866_v46 = vpop.f32.mrb[15].mxu0  ;;  %v1937_v50 = vpop.f32.mrb[23].mxu1  ;;  %v4600_v61 = vadd.f32 %v1935_v1, %v5354_v54 }
 0x834   :  { %v4561_v10 = vadd.f32 %v1866_v46, %v5345_v52  ;;  %v4601_v49 = vadd.f32 %v1937_v50, %v5351_v63 }
 0x835   :  { %4756 = vtanh.f32 %v4560_v40 }
 0x836   :  { %4758 = vtanh.f32 %v4561_v10 }
 0x837   :  { %4760 = vtanh.f32 %v4601_v49 }
 0x838   :  { %4762 = vtanh.f32 %v4600_v61 }
 0x83f   :  { %v4757_v62 = vpop.eup %4756 }
 0x840   :  { %v1947_v22 = vmul.f32 0.5, %v4757_v62  ;;  %v4759_v11 = vpop.eup %4758 }
 0x841   :  { %v1948_v14 = vmul.f32 0.5, %v4759_v11  ;;  %v4761_v37 = vpop.eup %4760 }
 0x842   :  { %v1950_v12 = vadd.f32 0.5, %v1947_v22  ;;  %v4763_v57 = vpop.eup %4762 }
 0x843   :  { %v1951_v26 = vadd.f32 0.5, %v1948_v14  ;;  %v1949_v40 = vmul.f32 0.5, %v4763_v57 }
 0x844   :  { %v1955_v3 = vmul.f32 %v4761_v37, %v1950_v12 }
 0x845   :  { %v1954_v34 = vmul.f32 %v1951_v26, %v5609_v2  ;;  %v1952_v46 = vadd.f32 0.5, %v1949_v40 }
 0x847   :  { %v5651_v43 = vadd.f32 %v1955_v3, %v1954_v34 }
 0x849   :  { %4764 = vtanh.f32 %v5651_v43 }
 0x853   :  { %v4765_v50 = vpop.eup %4764 }
 0x854   :  { %v1958_v1 = vmul.f32 %v4765_v50, %v1952_v46 }
 0x856   :  { %2029 = vmatmul.mubr.f32.vlgmr.msra.gmra.mrb[16].mxu0 %v1958_v1  ;;  %2100 = vmatmul.mubr.f32.vlgmr.msra.gmra.mrb[24].mxu1 %v1958_v1 }
 0x857   :  { %4075 = vmatpush1.bf16.msra.mxu0 %v5097_v25  ;;  %4107 = vmatpush1.bf16.msra.mxu1 %v5147_v55 }
 0x858   :  { %4077 = vmatprep.subr.bf16.mxu0 %v5103_v30  ;;  %4109 = vmatprep.subr.bf16.mxu1 %v5149_v56 }
 0x859   :  { %2194 = vmatprep.mubr.f32.mxu0 %v4972_v0  ;;  %2265 = vmatprep.mubr.f32.mxu1 %v4972_v0 }
 0x85b   :  { %4079 = vmatpush1.bf16.msra.mxu0 %v5105_v31  ;;  %4111 = vmatpush1.bf16.msra.mxu1 %v5165_v4 }
 0x85c   :  { %4081 = vmatprep.subr.bf16.mxu0 %v5118_v38  ;;  %4113 = vmatprep.subr.bf16.mxu1 %v5170_v8 }
 0x85f   :  { %4083 = vmatpush1.bf16.msra.mxu0 %v5121_v39  ;;  %4115 = vmatpush1.bf16.msra.mxu1 %v5184_v18 }
 0x860   :  { %4085 = vmatprep.subr.bf16.mxu0 %v5134_v48  ;;  %4117 = vmatprep.subr.bf16.mxu1 %v5192_v27 }
 0x863   :  { %4087 = vmatpush1.bf16.msra.mxu0 %v5137_v51  ;;  %4119 = vmatpush1.bf16.msra.mxu1 %v5206_v42 }
 0x864   :  { %4089 = vmatprep.subr.bf16.mxu0 %v5153_v59  ;;  %4121 = vmatprep.subr.bf16.mxu1 %v5212_v47 }
 0x867   :  { %4091 = vmatpush1.bf16.msra.mxu0 %v5167_v5  ;;  %4123 = vmatpush1.bf16.msra.mxu1 %v5224_v60 }
 0x868   :  { %4093 = vmatprep.subr.bf16.mxu0 %v5172_v9  ;;  %4125 = vmatprep.subr.bf16.mxu1 %v5228_v44 }
 0x86b   :  { %4095 = vmatpush1.bf16.msra.mxu0 %v5186_v21  ;;  %4127 = vmatpush1.bf16.msra.mxu1 %v5237_v6 }
 0x86c   :  { %4097 = vmatprep.subr.bf16.mxu0 %v5190_v23  ;;  %4129 = vmatprep.subr.bf16.mxu1 %v5240_v7 }
 0x86f   :  { %4099 = vmatpush1.bf16.msra.mxu0 %v5204_v41  ;;  %4131 = vmatpush1.bf16.msra.mxu1 %v5249_v15 }
 0x870   :  { %4101 = vmatprep.subr.bf16.mxu0 %v5210_v35  ;;  %4133 = vmatprep.subr.bf16.mxu1 %v5252_v16 }
 0x873   :  { %4103 = vmatpush1.bf16.msra.mxu0 %v5222_v58  ;;  %4135 = vmatpush1.bf16.msra.mxu1 %v5260_v28 }
 0x874   :  { %4137 = vmatprep.subr.bf16.mxu0 %v5088_v19  ;;  %4169 = vmatprep.subr.bf16.mxu1 %v5090_v20 }
 0x929   :  { %v2030_v2 = vpop.f32.mrb[16].mxu0  ;;  %v2101_v10 = vpop.f32.mrb[24].mxu1 }
 0x92a   :  { %v4562_v49 = vadd.f32 %v2030_v2, %v5347_v53  ;;  %v2032_v61 = vpop.f32.mrb[17].mxu0  ;;  %v2103_v62 = vpop.f32.mrb[25].mxu1  ;;  %v4602_v12 = vadd.f32 %v2101_v10, %v5354_v54 }
 0x92b   :  { %v4563_v22 = vadd.f32 %v2032_v61, %v5345_v52  ;;  %v4603_v11 = vadd.f32 %v2103_v62, %v5351_v63 }
 0x92c   :  { %4766 = vtanh.f32 %v4562_v49 }
 0x92d   :  { %4768 = vtanh.f32 %v4563_v22 }
 0x92e   :  { %4770 = vtanh.f32 %v4603_v11 }
 0x92f   :  { %4772 = vtanh.f32 %v4602_v12 }
 0x936   :  { %v4767_v14 = vpop.eup %4766 }
 0x937   :  { %v2113_v37 = vmul.f32 0.5, %v4767_v14  ;;  %v4769_v26 = vpop.eup %4768 }
 0x938   :  { %v2114_v34 = vmul.f32 0.5, %v4769_v26  ;;  %v4771_v57 = vpop.eup %4770 }
 0x939   :  { %v2116_v3 = vadd.f32 0.5, %v2113_v37  ;;  %v4773_v2 = vpop.eup %4772 }
 0x93a   :  { %v2117_v40 = vadd.f32 0.5, %v2114_v34  ;;  %v2115_v49 = vmul.f32 0.5, %v4773_v2 }
 0x93b   :  { %v2121_v46 = vmul.f32 %v4771_v57, %v2116_v3 }
 0x93c   :  { %v2120_v50 = vmul.f32 %v2117_v40, %v5651_v43  ;;  %v2118_v61 = vadd.f32 0.5, %v2115_v49 }
 0x93e   :  { %v5693_v1 = vadd.f32 %v2121_v46, %v2120_v50 }
 0x940   :  { %4774 = vtanh.f32 %v5693_v1 }
 0x94a   :  { %v4775_v62 = vpop.eup %4774 }
 0x94b   :  { %v2124_v10 = vmul.f32 %v4775_v62, %v2118_v61 }
 0x94d   :  { %2195 = vmatmul.mubr.f32.vlgmr.msra.gmra.mrb[18].mxu0 %v2124_v10  ;;  %2266 = vmatmul.mubr.f32.vlgmr.msra.gmra.mrb[26].mxu1 %v2124_v10 }
 0x94e   :  { %4139 = vmatpush1.bf16.msra.mxu0 %v5097_v25  ;;  %4171 = vmatpush1.bf16.msra.mxu1 %v5147_v55 }
 0x94f   :  { %4141 = vmatprep.subr.bf16.mxu0 %v5103_v30  ;;  %4173 = vmatprep.subr.bf16.mxu1 %v5149_v56 }
 0x950   :  { %2360 = vmatprep.mubr.f32.mxu0 %v4972_v0  ;;  %2431 = vmatprep.mubr.f32.mxu1 %v4972_v0 }
 0x952   :  { %4143 = vmatpush1.bf16.msra.mxu0 %v5105_v31  ;;  %4175 = vmatpush1.bf16.msra.mxu1 %v5165_v4 }
 0x953   :  { %4145 = vmatprep.subr.bf16.mxu0 %v5118_v38  ;;  %4177 = vmatprep.subr.bf16.mxu1 %v5170_v8 }
 0x956   :  { %4147 = vmatpush1.bf16.msra.mxu0 %v5121_v39  ;;  %4179 = vmatpush1.bf16.msra.mxu1 %v5184_v18 }
 0x957   :  { %4149 = vmatprep.subr.bf16.mxu0 %v5134_v48  ;;  %4181 = vmatprep.subr.bf16.mxu1 %v5192_v27 }
 0x95a   :  { %4151 = vmatpush1.bf16.msra.mxu0 %v5137_v51  ;;  %4183 = vmatpush1.bf16.msra.mxu1 %v5206_v42 }
 0x95b   :  { %4153 = vmatprep.subr.bf16.mxu0 %v5153_v59  ;;  %4185 = vmatprep.subr.bf16.mxu1 %v5212_v47 }
 0x95e   :  { %4155 = vmatpush1.bf16.msra.mxu0 %v5167_v5  ;;  %4187 = vmatpush1.bf16.msra.mxu1 %v5224_v60 }
 0x95f   :  { %4157 = vmatprep.subr.bf16.mxu0 %v5172_v9  ;;  %4189 = vmatprep.subr.bf16.mxu1 %v5228_v44 }
 0x962   :  { %4159 = vmatpush1.bf16.msra.mxu0 %v5186_v21  ;;  %4191 = vmatpush1.bf16.msra.mxu1 %v5237_v6 }
 0x963   :  { %4161 = vmatprep.subr.bf16.mxu0 %v5190_v23  ;;  %4193 = vmatprep.subr.bf16.mxu1 %v5240_v7 }
 0x966   :  { %4163 = vmatpush1.bf16.msra.mxu0 %v5204_v41  ;;  %4195 = vmatpush1.bf16.msra.mxu1 %v5249_v15 }
 0x967   :  { %4165 = vmatprep.subr.bf16.mxu0 %v5210_v35  ;;  %4197 = vmatprep.subr.bf16.mxu1 %v5252_v16 }
 0x96a   :  { %4167 = vmatpush1.bf16.msra.mxu0 %v5222_v58  ;;  %4199 = vmatpush1.bf16.msra.mxu1 %v5260_v28 }
 0x96b   :  { %4201 = vmatprep.subr.bf16.mxu0 %v5088_v19  ;;  %4233 = vmatprep.subr.bf16.mxu1 %v5090_v20 }
 0xa20   :  { %v2196_v43 = vpop.f32.mrb[18].mxu0  ;;  %v2267_v22 = vpop.f32.mrb[26].mxu1 }
 0xa21   :  { %v4564_v11 = vadd.f32 %v2196_v43, %v5347_v53  ;;  %v2198_v12 = vpop.f32.mrb[19].mxu0  ;;  %v2269_v14 = vpop.f32.mrb[27].mxu1  ;;  %v4604_v3 = vadd.f32 %v2267_v22, %v5354_v54 }
 0xa22   :  { %v4565_v37 = vadd.f32 %v2198_v12, %v5345_v52  ;;  %v4605_v26 = vadd.f32 %v2269_v14, %v5351_v63 }
 0xa23   :  { %4776 = vtanh.f32 %v4564_v11 }
 0xa24   :  { %4778 = vtanh.f32 %v4565_v37 }
 0xa25   :  { %4780 = vtanh.f32 %v4605_v26 }
 0xa26   :  { %4782 = vtanh.f32 %v4604_v3 }
 0xa2d   :  { %v4777_v34 = vpop.eup %4776 }
 0xa2e   :  { %v2279_v57 = vmul.f32 0.5, %v4777_v34  ;;  %v4779_v40 = vpop.eup %4778 }
 0xa2f   :  { %v2280_v50 = vmul.f32 0.5, %v4779_v40  ;;  %v4781_v2 = vpop.eup %4780 }
 0xa30   :  { %v2282_v46 = vadd.f32 0.5, %v2279_v57  ;;  %v4783_v43 = vpop.eup %4782 }
 0xa31   :  { %v2283_v49 = vadd.f32 0.5, %v2280_v50  ;;  %v2281_v11 = vmul.f32 0.5, %v4783_v43 }
 0xa32   :  { %v2287_v61 = vmul.f32 %v4781_v2, %v2282_v46 }
 0xa33   :  { %v2286_v62 = vmul.f32 %v2283_v49, %v5693_v1  ;;  %v2284_v12 = vadd.f32 0.5, %v2281_v11 }
 0xa35   :  { %v5735_v10 = vadd.f32 %v2287_v61, %v2286_v62 }
 0xa37   :  { %4784 = vtanh.f32 %v5735_v10 }
 0xa41   :  { %v4785_v14 = vpop.eup %4784 }
 0xa42   :  { %v2290_v22 = vmul.f32 %v4785_v14, %v2284_v12 }
 0xa44   :  { %2361 = vmatmul.mubr.f32.vlgmr.msra.gmra.mrb[20].mxu0 %v2290_v22  ;;  %2432 = vmatmul.mubr.f32.vlgmr.msra.gmra.mrb[28].mxu1 %v2290_v22 }
 0xa45   :  { %4203 = vmatpush1.bf16.msra.mxu0 %v5097_v25  ;;  %4235 = vmatpush1.bf16.msra.mxu1 %v5147_v55 }
 0xa46   :  { %4205 = vmatprep.subr.bf16.mxu0 %v5103_v30  ;;  %4237 = vmatprep.subr.bf16.mxu1 %v5149_v56 }
 0xa47   :  { %2526 = vmatprep.mubr.f32.mxu0 %v4972_v0  ;;  %2597 = vmatprep.mubr.f32.mxu1 %v4972_v0 }
 0xa49   :  { %4207 = vmatpush1.bf16.msra.mxu0 %v5105_v31  ;;  %4239 = vmatpush1.bf16.msra.mxu1 %v5165_v4 }
 0xa4a   :  { %4209 = vmatprep.subr.bf16.mxu0 %v5118_v38  ;;  %4241 = vmatprep.subr.bf16.mxu1 %v5170_v8 }
 0xa4d   :  { %4211 = vmatpush1.bf16.msra.mxu0 %v5121_v39  ;;  %4243 = vmatpush1.bf16.msra.mxu1 %v5184_v18 }
 0xa4e   :  { %4213 = vmatprep.subr.bf16.mxu0 %v5134_v48  ;;  %4245 = vmatprep.subr.bf16.mxu1 %v5192_v27 }
 0xa51   :  { %4215 = vmatpush1.bf16.msra.mxu0 %v5137_v51  ;;  %4247 = vmatpush1.bf16.msra.mxu1 %v5206_v42 }
 0xa52   :  { %4217 = vmatprep.subr.bf16.mxu0 %v5153_v59  ;;  %4249 = vmatprep.subr.bf16.mxu1 %v5212_v47 }
 0xa55   :  { %4219 = vmatpush1.bf16.msra.mxu0 %v5167_v5  ;;  %4251 = vmatpush1.bf16.msra.mxu1 %v5224_v60 }
 0xa56   :  { %4221 = vmatprep.subr.bf16.mxu0 %v5172_v9  ;;  %4253 = vmatprep.subr.bf16.mxu1 %v5228_v44 }
 0xa59   :  { %4223 = vmatpush1.bf16.msra.mxu0 %v5186_v21  ;;  %4255 = vmatpush1.bf16.msra.mxu1 %v5237_v6 }
 0xa5a   :  { %4225 = vmatprep.subr.bf16.mxu0 %v5190_v23  ;;  %4257 = vmatprep.subr.bf16.mxu1 %v5240_v7 }
 0xa5d   :  { %4227 = vmatpush1.bf16.msra.mxu0 %v5204_v41  ;;  %4259 = vmatpush1.bf16.msra.mxu1 %v5249_v15 }
 0xa5e   :  { %4229 = vmatprep.subr.bf16.mxu0 %v5210_v35  ;;  %4261 = vmatprep.subr.bf16.mxu1 %v5252_v16 }
 0xa61   :  { %4231 = vmatpush1.bf16.msra.mxu0 %v5222_v58  ;;  %4263 = vmatpush1.bf16.msra.mxu1 %v5260_v28 }
 0xa62   :  { %4265 = vmatprep.subr.bf16.mxu0 %v5088_v19  ;;  %4297 = vmatprep.subr.bf16.mxu1 %v5090_v20 }
 0xb17   :  { %v2362_v1 = vpop.f32.mrb[20].mxu0  ;;  %v2433_v37 = vpop.f32.mrb[28].mxu1 }
 0xb18   :  { %v4566_v26 = vadd.f32 %v2362_v1, %v5347_v53  ;;  %v2364_v3 = vpop.f32.mrb[21].mxu0  ;;  %v2435_v34 = vpop.f32.mrb[29].mxu1  ;;  %v4606_v46 = vadd.f32 %v2433_v37, %v5354_v54 }
 0xb19   :  { %v4567_v57 = vadd.f32 %v2364_v3, %v5345_v52  ;;  %v4607_v40 = vadd.f32 %v2435_v34, %v5351_v63 }
 0xb1a   :  { %4786 = vtanh.f32 %v4566_v26 }
 0xb1b   :  { %4788 = vtanh.f32 %v4567_v57 }
 0xb1c   :  { %4790 = vtanh.f32 %v4607_v40 }
 0xb1d   :  { %4792 = vtanh.f32 %v4606_v46 }
 0xb24   :  { %v4787_v50 = vpop.eup %4786 }
 0xb25   :  { %v2445_v2 = vmul.f32 0.5, %v4787_v50  ;;  %v4789_v49 = vpop.eup %4788 }
 0xb26   :  { %v2446_v62 = vmul.f32 0.5, %v4789_v49  ;;  %v4791_v43 = vpop.eup %4790 }
 0xb27   :  { %v2448_v61 = vadd.f32 0.5, %v2445_v2  ;;  %v4793_v1 = vpop.eup %4792 }
 0xb28   :  { %v2449_v11 = vadd.f32 0.5, %v2446_v62  ;;  %v2447_v26 = vmul.f32 0.5, %v4793_v1 }
 0xb29   :  { %v2453_v12 = vmul.f32 %v4791_v43, %v2448_v61 }
 0xb2a   :  { %v2452_v14 = vmul.f32 %v2449_v11, %v5735_v10  ;;  %v2450_v3 = vadd.f32 0.5, %v2447_v26 }
 0xb2c   :  { %v5777_v22 = vadd.f32 %v2453_v12, %v2452_v14 }
 0xb2e   :  { %4794 = vtanh.f32 %v5777_v22 }
 0xb38   :  { %v4795_v34 = vpop.eup %4794 }
 0xb39   :  { %v2456_v37 = vmul.f32 %v4795_v34, %v2450_v3 }
 0xb3b   :  { %2527 = vmatmul.mubr.f32.vlgmr.msra.gmra.mrb[22].mxu0 %v2456_v37  ;;  %2598 = vmatmul.mubr.f32.vlgmr.msra.gmra.mrb[30].mxu1 %v2456_v37 }
 0xb3c   :  { %4267 = vmatpush1.bf16.msra.mxu0 %v5097_v25  ;;  %4299 = vmatpush1.bf16.msra.mxu1 %v5147_v55 }
 0xb3d   :  { %4269 = vmatprep.subr.bf16.mxu0 %v5103_v30  ;;  %4301 = vmatprep.subr.bf16.mxu1 %v5149_v56 }
 0xb3e   :  { %2692 = vmatprep.mubr.f32.mxu0 %v4972_v0  ;;  %2763 = vmatprep.mubr.f32.mxu1 %v4972_v0 }
 0xb40   :  { %4271 = vmatpush1.bf16.msra.mxu0 %v5105_v31  ;;  %4303 = vmatpush1.bf16.msra.mxu1 %v5165_v4 }
 0xb41   :  { %4273 = vmatprep.subr.bf16.mxu0 %v5118_v38  ;;  %4305 = vmatprep.subr.bf16.mxu1 %v5170_v8 }
 0xb44   :  { %4275 = vmatpush1.bf16.msra.mxu0 %v5121_v39  ;;  %4307 = vmatpush1.bf16.msra.mxu1 %v5184_v18 }
 0xb45   :  { %4277 = vmatprep.subr.bf16.mxu0 %v5134_v48  ;;  %4309 = vmatprep.subr.bf16.mxu1 %v5192_v27 }
 0xb48   :  { %4279 = vmatpush1.bf16.msra.mxu0 %v5137_v51  ;;  %4311 = vmatpush1.bf16.msra.mxu1 %v5206_v42 }
 0xb49   :  { %4281 = vmatprep.subr.bf16.mxu0 %v5153_v59  ;;  %4313 = vmatprep.subr.bf16.mxu1 %v5212_v47 }
 0xb4c   :  { %4283 = vmatpush1.bf16.msra.mxu0 %v5167_v5  ;;  %4315 = vmatpush1.bf16.msra.mxu1 %v5224_v60 }
 0xb4d   :  { %4285 = vmatprep.subr.bf16.mxu0 %v5172_v9  ;;  %4317 = vmatprep.subr.bf16.mxu1 %v5228_v44 }
 0xb50   :  { %4287 = vmatpush1.bf16.msra.mxu0 %v5186_v21  ;;  %4319 = vmatpush1.bf16.msra.mxu1 %v5237_v6 }
 0xb51   :  { %4289 = vmatprep.subr.bf16.mxu0 %v5190_v23  ;;  %4321 = vmatprep.subr.bf16.mxu1 %v5240_v7 }
 0xb54   :  { %4291 = vmatpush1.bf16.msra.mxu0 %v5204_v41  ;;  %4323 = vmatpush1.bf16.msra.mxu1 %v5249_v15 }
 0xb55   :  { %4293 = vmatprep.subr.bf16.mxu0 %v5210_v35  ;;  %4325 = vmatprep.subr.bf16.mxu1 %v5252_v16 }
 0xb58   :  { %4295 = vmatpush1.bf16.msra.mxu0 %v5222_v58  ;;  %4327 = vmatpush1.bf16.msra.mxu1 %v5260_v28 }
 0xb59   :  { %4329 = vmatprep.subr.bf16.mxu0 %v5088_v19  ;;  %4361 = vmatprep.subr.bf16.mxu1 %v5090_v20 }
 0xc0e   :  { %v2528_v10 = vpop.f32.mrb[22].mxu0  ;;  %v2599_v57 = vpop.f32.mrb[30].mxu1 }
 0xc0f   :  { %v4568_v40 = vadd.f32 %v2528_v10, %v5347_v53  ;;  %v2530_v46 = vpop.f32.mrb[23].mxu0  ;;  %v2601_v50 = vpop.f32.mrb[31].mxu1  ;;  %v4608_v61 = vadd.f32 %v2599_v57, %v5354_v54 }
 0xc10   :  { %v4569_v2 = vadd.f32 %v2530_v46, %v5345_v52  ;;  %v4609_v49 = vadd.f32 %v2601_v50, %v5351_v63 }
 0xc11   :  { %4796 = vtanh.f32 %v4568_v40 }
 0xc12   :  { %4798 = vtanh.f32 %v4569_v2  ;;  %v321_v2 = vadd.f32 %v5328_v24, %v5345_v52 }
 0xc13   :  { %4800 = vtanh.f32 %v4609_v49 }
 0xc14   :  { %4802 = vtanh.f32 %v4608_v61 }
 0xc1b   :  { %v4797_v62 = vpop.eup %4796 }
 0xc1c   :  { %v2611_v43 = vmul.f32 0.5, %v4797_v62  ;;  %v4799_v11 = vpop.eup %4798 }
 0xc1d   :  { %v2612_v14 = vmul.f32 0.5, %v4799_v11  ;;  %v4801_v1 = vpop.eup %4800 }
 0xc1e   :  { %v2614_v12 = vadd.f32 0.5, %v2611_v43  ;;  %v4803_v10 = vpop.eup %4802 }
 0xc1f   :  { %v2615_v26 = vadd.f32 0.5, %v2612_v14  ;;  %v2613_v40 = vmul.f32 0.5, %v4803_v10 }
 0xc20   :  { %v2619_v3 = vmul.f32 %v4801_v1, %v2614_v12 }
 0xc21   :  { %v2618_v34 = vmul.f32 %v2615_v26, %v5777_v22  ;;  %v2616_v46 = vadd.f32 0.5, %v2613_v40  ;;  %v319_v22 = vadd.f32 %v5326_v13, %v5347_v53 }
 0xc23   :  { %v5819_v37 = vadd.f32 %v2619_v3, %v2618_v34 }
 0xc25   :  { %4804 = vtanh.f32 %v5819_v37 }
 0xc2f   :  { %v4805_v50 = vpop.eup %4804 }
 0xc30   :  { %v2622_v57 = vmul.f32 %v4805_v50, %v2616_v46 }
 0xc32   :  { %2693 = vmatmul.mubr.f32.vlgmr.msra.gmra.mrb[24].mxu0 %v2622_v57  ;;  %2764 = vmatmul.mubr.f32.vlgmr.msra.gmra.mrb[32].mxu1 %v2622_v57 }
 0xc33   :  { %4331 = vmatpush1.bf16.msra.mxu0 %v5097_v25  ;;  %4363 = vmatpush1.bf16.msra.mxu1 %v5147_v55 }
 0xc34   :  { %4333 = vmatprep.subr.bf16.mxu0 %v5103_v30  ;;  %4365 = vmatprep.subr.bf16.mxu1 %v5149_v56 }
 0xc35   :  { %2858 = vmatprep.mubr.f32.mxu0 %v4972_v0  ;;  %2929 = vmatprep.mubr.f32.mxu1 %v4972_v0 }
 0xc37   :  { %4335 = vmatpush1.bf16.msra.mxu0 %v5105_v31  ;;  %4367 = vmatpush1.bf16.msra.mxu1 %v5165_v4 }
 0xc38   :  { %4337 = vmatprep.subr.bf16.mxu0 %v5118_v38  ;;  %4369 = vmatprep.subr.bf16.mxu1 %v5170_v8 }
 0xc3b   :  { %4339 = vmatpush1.bf16.msra.mxu0 %v5121_v39  ;;  %4371 = vmatpush1.bf16.msra.mxu1 %v5184_v18 }
 0xc3c   :  { %4341 = vmatprep.subr.bf16.mxu0 %v5134_v48  ;;  %4373 = vmatprep.subr.bf16.mxu1 %v5192_v27 }
 0xc3f   :  { %4343 = vmatpush1.bf16.msra.mxu0 %v5137_v51  ;;  %4375 = vmatpush1.bf16.msra.mxu1 %v5206_v42 }
 0xc40   :  { %4345 = vmatprep.subr.bf16.mxu0 %v5153_v59  ;;  %4377 = vmatprep.subr.bf16.mxu1 %v5212_v47 }
 0xc43   :  { %4347 = vmatpush1.bf16.msra.mxu0 %v5167_v5  ;;  %4379 = vmatpush1.bf16.msra.mxu1 %v5224_v60 }
 0xc44   :  { %4349 = vmatprep.subr.bf16.mxu0 %v5172_v9  ;;  %4381 = vmatprep.subr.bf16.mxu1 %v5228_v44 }
 0xc47   :  { %4351 = vmatpush1.bf16.msra.mxu0 %v5186_v21  ;;  %4383 = vmatpush1.bf16.msra.mxu1 %v5237_v6 }
 0xc48   :  { %4353 = vmatprep.subr.bf16.mxu0 %v5190_v23  ;;  %4385 = vmatprep.subr.bf16.mxu1 %v5240_v7 }
 0xc4b   :  { %4355 = vmatpush1.bf16.msra.mxu0 %v5204_v41  ;;  %4387 = vmatpush1.bf16.msra.mxu1 %v5249_v15 }
 0xc4c   :  { %4357 = vmatprep.subr.bf16.mxu0 %v5210_v35  ;;  %4389 = vmatprep.subr.bf16.mxu1 %v5252_v16 }
 0xc4f   :  { %4359 = vmatpush1.bf16.msra.mxu0 %v5222_v58  ;;  %4391 = vmatpush1.bf16.msra.mxu1 %v5260_v28 }
 0xc50   :  { %4393 = vmatprep.subr.bf16.mxu0 %v5088_v19  ;;  %4425 = vmatprep.subr.bf16.mxu1 %v5090_v20 }
 0xd05   :  { %v2694_v49 = vpop.f32.mrb[24].mxu0  ;;  %v2765_v61 = vpop.f32.mrb[32].mxu1 }
 0xd06   :  { %v2770_v62 = vadd.f32 %v2694_v49, %v319_v22  ;;  %v2696_v43 = vpop.f32.mrb[25].mxu0  ;;  %v2767_v11 = vpop.f32.mrb[33].mxu1  ;;  %v4610_v1 = vadd.f32 %v2765_v61, %v5354_v54 }
 0xd07   :  { %v2771_v12 = vadd.f32 %v2696_v43, %v321_v2  ;;  %v4611_v14 = vadd.f32 %v2767_v11, %v5351_v63  ;;  %v327_v43 = vadd.f32 %v5332_v45, %v5345_v52 }
 0xd08   :  { %4806 = vtanh.f32 %v2770_v62 }
 0xd09   :  { %4808 = vtanh.f32 %v2771_v12 }
 0xd0a   :  { %4810 = vtanh.f32 %v4611_v14 }
 0xd0b   :  { %4812 = vtanh.f32 %v4610_v1 }
 0xd12   :  { %v4807_v26 = vpop.eup %4806 }
 0xd13   :  { %v2777_v3 = vmul.f32 0.5, %v4807_v26  ;;  %v4809_v34 = vpop.eup %4808 }
 0xd14   :  { %v2778_v10 = vmul.f32 0.5, %v4809_v34  ;;  %v4811_v24 = vpop.eup %4810 }
 0xd15   :  { %v2780_v13 = vadd.f32 0.5, %v2777_v3  ;;  %v4813_v22 = vpop.eup %4812 }
 0xd16   :  { %v2781_v40 = vadd.f32 0.5, %v2778_v10  ;;  %v2779_v2 = vmul.f32 0.5, %v4813_v22 }
 0xd17   :  { %v2785_v46 = vmul.f32 %v4811_v24, %v2780_v13 }
 0xd18   :  { %v2784_v50 = vmul.f32 %v2781_v40, %v5819_v37  ;;  %v2782_v49 = vadd.f32 0.5, %v2779_v2  ;;  %v325_v37 = vadd.f32 %v5330_v36, %v5347_v53 }
 0xd1a   :  { %v5863_v57 = vadd.f32 %v2785_v46, %v2784_v50 }
 0xd1c   :  { %4814 = vtanh.f32 %v5863_v57 }
 0xd26   :  { %v4815_v62 = vpop.eup %4814 }
 0xd27   :  { %v2788_v61 = vmul.f32 %v4815_v62, %v2782_v49 }
 0xd29   :  { %2859 = vmatmul.mubr.f32.vlgmr.msra.gmra.mrb[26].mxu0 %v2788_v61  ;;  %2930 = vmatmul.mubr.f32.vlgmr.msra.gmra.mrb[34].mxu1 %v2788_v61 }
 0xd2a   :  { %4395 = vmatpush1.bf16.msra.mxu0 %v5097_v25  ;;  %4427 = vmatpush1.bf16.msra.mxu1 %v5147_v55 }
 0xd2b   :  { %4397 = vmatprep.subr.bf16.mxu0 %v5103_v30  ;;  %4429 = vmatprep.subr.bf16.mxu1 %v5149_v56 }
 0xd2c   :  { %3024 = vmatprep.mubr.f32.mxu0 %v4972_v0  ;;  %3095 = vmatprep.mubr.f32.mxu1 %v4972_v0 }
 0xd2e   :  { %4399 = vmatpush1.bf16.msra.mxu0 %v5105_v31  ;;  %4431 = vmatpush1.bf16.msra.mxu1 %v5165_v4 }
 0xd2f   :  { %4401 = vmatprep.subr.bf16.mxu0 %v5118_v38  ;;  %4433 = vmatprep.subr.bf16.mxu1 %v5170_v8 }
 0xd32   :  { %4403 = vmatpush1.bf16.msra.mxu0 %v5121_v39  ;;  %4435 = vmatpush1.bf16.msra.mxu1 %v5184_v18 }
 0xd33   :  { %4405 = vmatprep.subr.bf16.mxu0 %v5134_v48  ;;  %4437 = vmatprep.subr.bf16.mxu1 %v5192_v27 }
 0xd36   :  { %4407 = vmatpush1.bf16.msra.mxu0 %v5137_v51  ;;  %4439 = vmatpush1.bf16.msra.mxu1 %v5206_v42 }
 0xd37   :  { %4409 = vmatprep.subr.bf16.mxu0 %v5153_v59  ;;  %4441 = vmatprep.subr.bf16.mxu1 %v5212_v47 }
 0xd3a   :  { %4411 = vmatpush1.bf16.msra.mxu0 %v5167_v5  ;;  %4443 = vmatpush1.bf16.msra.mxu1 %v5224_v60 }
 0xd3b   :  { %4413 = vmatprep.subr.bf16.mxu0 %v5172_v9  ;;  %4445 = vmatprep.subr.bf16.mxu1 %v5228_v44 }
 0xd3e   :  { %4415 = vmatpush1.bf16.msra.mxu0 %v5186_v21  ;;  %4447 = vmatpush1.bf16.msra.mxu1 %v5237_v6 }
 0xd3f   :  { %4417 = vmatprep.subr.bf16.mxu0 %v5190_v23  ;;  %4449 = vmatprep.subr.bf16.mxu1 %v5240_v7 }
 0xd42   :  { %4419 = vmatpush1.bf16.msra.mxu0 %v5204_v41  ;;  %4451 = vmatpush1.bf16.msra.mxu1 %v5249_v15 }
 0xd43   :  { %4421 = vmatprep.subr.bf16.mxu0 %v5210_v35  ;;  %4453 = vmatprep.subr.bf16.mxu1 %v5252_v16 }
 0xd46   :  { %4423 = vmatpush1.bf16.msra.mxu0 %v5222_v58  ;;  %4455 = vmatpush1.bf16.msra.mxu1 %v5260_v28 }
 0xd47   :  { %4457 = vmatprep.subr.bf16.mxu0 %v5088_v19  ;;  %4489 = vmatprep.subr.bf16.mxu1 %v5090_v20 }
 0xdfc   :  { %v2860_v11 = vpop.f32.mrb[26].mxu0  ;;  %v2931_v12 = vpop.f32.mrb[34].mxu1 }
 0xdfd   :  { %v2936_v14 = vadd.f32 %v2860_v11, %v325_v37  ;;  %v2862_v1 = vpop.f32.mrb[27].mxu0  ;;  %v2933_v26 = vpop.f32.mrb[35].mxu1  ;;  %v4612_v19 = vadd.f32 %v2931_v12, %v5354_v54  ;;  %v3298_v12 = vld [vmem:[#allocation11 + $0x30] sm:$0xff] }
 0xdfe   :  { %v2937_v3 = vadd.f32 %v2862_v1, %v327_v43  ;;  %v4613_v34 = vadd.f32 %v2933_v26, %v5351_v63  ;;  %v3297_v43 = vld [vmem:[#allocation11 + $0x28] sm:$0xff]  ;;  %v3300_v26 = vld [vmem:[#allocation11 + $0x40] sm:$0xff] }
 0xdff   :  { %4816 = vtanh.f32 %v2936_v14  ;;  %v3299_v14 = vld [vmem:[#allocation11 + $0x38] sm:$0xff] }
 0xe00   :  { %4818 = vtanh.f32 %v2937_v3  ;;  %v4530_v1 = vpack.c.bf16 %v3299_v14, %v3298_v12  ;;  %v3301_v3 = vld [vmem:[#allocation11 + $0x48] sm:$0xff] }
 0xe01   :  { %4820 = vtanh.f32 %v4613_v34  ;;  %v4533_v34 = vpack.c.bf16 %v3301_v3, %v3300_v26 }
 0xe02   :  { %4822 = vtanh.f32 %v4612_v19  ;;  %v3302_v19 = vld [vmem:[#allocation11 + $0x50] sm:$0xff] }
 0xe09   :  { %v4817_v20 = vpop.eup %4816 }
 0xe0a   :  { %v2943_v13 = vmul.f32 0.5, %v4817_v20  ;;  %v4819_v10 = vpop.eup %4818  ;;  %v3303_v20 = vld [vmem:[#allocation11 + $0x58] sm:$0xff] }
 0xe0b   :  { %v2944_v24 = vmul.f32 0.5, %v4819_v10  ;;  %v4821_v45 = vpop.eup %4820  ;;  %v4536_v10 = vpack.c.bf16 %v3303_v20, %v3302_v19 }
 0xe0c   :  { %v2946_v36 = vadd.f32 0.5, %v2943_v13  ;;  %v4823_v2 = vpop.eup %4822  ;;  %v3304_v13 = vld [vmem:[#allocation11 + $0x60] sm:$0xff] }
 0xe0d   :  { %v2947_v40 = vadd.f32 0.5, %v2944_v24  ;;  %v2945_v49 = vmul.f32 0.5, %v4823_v2 }
 0xe0e   :  { %v2951_v46 = vmul.f32 %v4821_v45, %v2946_v36  ;;  %v3305_v36 = vld [vmem:[#allocation11 + $0x68] sm:$0xff]  ;;  %v3306_v45 = vld [vmem:[#allocation11 + $0x70] sm:$0xff] }
 0xe0f   :  { %v2950_v50 = vmul.f32 %v2947_v40, %v5863_v57  ;;  %v2948_v62 = vadd.f32 0.5, %v2945_v49  ;;  %v3296_v57 = vld [vmem:[#allocation11 + $0x20] sm:$0xff]  ;;  %v4539_v24 = vpack.c.bf16 %v3305_v36, %v3304_v13  ;;  %v3307_v40 = vld [vmem:[#allocation11 + $0x78] sm:$0xff] }
 0xe10   :  { %v4527_v11 = vpack.c.bf16 %v3297_v43, %v3296_v57 }
 0xe11   :  { %v5907_v22 = vadd.f32 %v2951_v46, %v2950_v50  ;;  %v4542_v46 = vpack.c.bf16 %v3307_v40, %v3306_v45  ;;  %v337_v50 = vadd.f32 %v5338_v32, %v5347_v53 }
 0xe13   :  { %4824 = vtanh.f32 %v5907_v22 }
 0xe1d   :  { %v4825_v61 = vpop.eup %4824 }
 0xe1e   :  { %v2954_v37 = vmul.f32 %v4825_v61, %v2948_v62 }
 0xe20   :  { %3025 = vmatmul.mubr.f32.vlgmr.msra.gmra.mrb[28].mxu0 %v2954_v37  ;;  %3096 = vmatmul.mubr.f32.vlgmr.msra.gmra.mrb[36].mxu1 %v2954_v37 }
 0xe21   :  { %4459 = vmatpush1.bf16.msra.mxu0 %v5097_v25  ;;  %4491 = vmatpush1.bf16.msra.mxu1 %v5147_v55  ;;  %v331_v25 = vadd.f32 %v5334_v17, %v5347_v53  ;;  %v3295_v17 = vld [vmem:[#allocation11 + $0x18] sm:$0xff] }
 0xe22   :  { %4461 = vmatprep.subr.bf16.mxu0 %v5103_v30  ;;  %4493 = vmatprep.subr.bf16.mxu1 %v5149_v56  ;;  %v333_v30 = vadd.f32 %v5336_v29, %v5345_v52 }
 0xe23   :  { %3190 = vmatprep.mubr.f32.mxu0 %v4972_v0  ;;  %3261 = vmatprep.mubr.f32.mxu1 %v4972_v0 }
 0xe25   :  { %4463 = vmatpush1.bf16.msra.mxu0 %v5105_v31  ;;  %4495 = vmatpush1.bf16.msra.mxu1 %v5165_v4 }
 0xe26   :  { %4465 = vmatprep.subr.bf16.mxu0 %v5118_v38  ;;  %4497 = vmatprep.subr.bf16.mxu1 %v5170_v8 }
 0xe29   :  { %4467 = vmatpush1.bf16.msra.mxu0 %v5121_v39  ;;  %4499 = vmatpush1.bf16.msra.mxu1 %v5184_v18 }
 0xe2a   :  { %4469 = vmatprep.subr.bf16.mxu0 %v5134_v48  ;;  %4501 = vmatprep.subr.bf16.mxu1 %v5192_v27 }
 0xe2d   :  { %4471 = vmatpush1.bf16.msra.mxu0 %v5137_v51  ;;  %4503 = vmatpush1.bf16.msra.mxu1 %v5206_v42 }
 0xe2e   :  { %4473 = vmatprep.subr.bf16.mxu0 %v5153_v59  ;;  %4505 = vmatprep.subr.bf16.mxu1 %v5212_v47 }
 0xe31   :  { %4475 = vmatpush1.bf16.msra.mxu0 %v5167_v5  ;;  %4507 = vmatpush1.bf16.msra.mxu1 %v5224_v60 }
 0xe32   :  { %4477 = vmatprep.subr.bf16.mxu0 %v5172_v9  ;;  %4509 = vmatprep.subr.bf16.mxu1 %v5228_v44 }
 0xe35   :  { %4479 = vmatpush1.bf16.msra.mxu0 %v5186_v21  ;;  %4511 = vmatpush1.bf16.msra.mxu1 %v5237_v6  ;;  %v3292_v6 = vld [vmem:[#allocation11] sm:$0xff] }
 0xe36   :  { %4481 = vmatprep.subr.bf16.mxu0 %v5190_v23  ;;  %4513 = vmatprep.subr.bf16.mxu1 %v5240_v7  ;;  %v3293_v7 = vld [vmem:[#allocation11 + $0x8] sm:$0xff] }
 0xe39   :  { %4483 = vmatpush1.bf16.msra.mxu0 %v5204_v41  ;;  %4515 = vmatpush1.bf16.msra.mxu1 %v5249_v15  ;;  %v4521_v15 = vpack.c.bf16 %v3293_v7, %v3292_v6 }
 0xe3a   :  { %4485 = vmatprep.subr.bf16.mxu0 %v5210_v35  ;;  %4517 = vmatprep.subr.bf16.mxu1 %v5252_v16  ;;  %v4973_v16 = vmov 0.0|0.0  }
 0xe3d   :  { %4487 = vmatpush1.bf16.msra.mxu0 %v5222_v58  ;;  %4519 = vmatpush1.bf16.msra.mxu1 %v5260_v28  ;;  %v3294_v28 = vld [vmem:[#allocation11 + $0x10] sm:$0xff] }
 0xe3e   :  { %4520 = vmatprep.subr.bf16.mxu0 %v4973_v16  ;;  %v4524_v29 = vpack.c.bf16 %v3295_v17, %v3294_v28 }
 0xef3   :  { %v3026_v31 = vpop.f32.mrb[28].mxu0  ;;  %v3097_v38 = vpop.f32.mrb[36].mxu1 }
 0xef4   :  { %v3102_v39 = vadd.f32 %v3026_v31, %v331_v25  ;;  %v3028_v48 = vpop.f32.mrb[29].mxu0  ;;  %v3099_v51 = vpop.f32.mrb[37].mxu1  ;;  %v4614_v59 = vadd.f32 %v3097_v38, %v5354_v54 }
 0xef5   :  { %v3103_v55 = vadd.f32 %v3028_v48, %v333_v30  ;;  %v4615_v56 = vadd.f32 %v3099_v51, %v5351_v63 }
 0xef6   :  { %4826 = vtanh.f32 %v3102_v39 }
 0xef7   :  { %4828 = vtanh.f32 %v3103_v55 }
 0xef8   :  { %4830 = vtanh.f32 %v4615_v56 }
 0xef9   :  { %4832 = vtanh.f32 %v4614_v59 }
 0xf00   :  { %v4827_v4 = vpop.eup %4826 }
 0xf01   :  { %v3109_v5 = vmul.f32 0.5, %v4827_v4  ;;  %v4829_v8 = vpop.eup %4828 }
 0xf02   :  { %v3110_v18 = vmul.f32 0.5, %v4829_v8  ;;  %v4831_v21 = vpop.eup %4830 }
 0xf03   :  { %v3112_v9 = vadd.f32 0.5, %v3109_v5  ;;  %v4833_v35 = vpop.eup %4832 }
 0xf04   :  { %v3113_v23 = vadd.f32 0.5, %v3110_v18  ;;  %v3111_v47 = vmul.f32 0.5, %v4833_v35 }
 0xf05   :  { %v3117_v27 = vmul.f32 %v4831_v21, %v3112_v9 }
 0xf06   :  { %v3116_v41 = vmul.f32 %v3113_v23, %v5907_v22  ;;  %v3114_v58 = vadd.f32 0.5, %v3111_v47  ;;  %v339_v22 = vadd.f32 %v5340_v33, %v5345_v52 }
 0xf08   :  { %v5949_v42 = vadd.f32 %v3117_v27, %v3116_v41 }
 0xf0a   :  { %4834 = vtanh.f32 %v5949_v42 }
 0xf14   :  { %v4835_v60 = vpop.eup %4834 }
 0xf15   :  { %v3120_v44 = vmul.f32 %v4835_v60, %v3114_v58 }
 0xf17   :  { %3191 = vmatmul.mubr.f32.vlgmr.msra.gmra.mrb[30].mxu0 %v3120_v44  ;;  %3262 = vmatmul.mubr.f32.vlgmr.msra.gmra.mrb[38].mxu1 %v3120_v44 }
 0xf18   :  { %4522 = vmatpush3.bf16.msra.mxu0 %v4521_v15  ;;  %3485 = vmatprep.mubr.msk.f32.mxu0 %vm4974_vm1, %v4972_v0 }
 0xf19   :  { %4523 = vmatprep.subr.bf16.mxu0 %v4973_v16 }
 0xf1c   :  { %4525 = vmatpush3.bf16.msra.mxu0 %v4524_v29 }
 0xf1d   :  { %4526 = vmatprep.subr.bf16.mxu0 %v4973_v16 }
 0xf20   :  { %4528 = vmatpush3.bf16.msra.mxu0 %v4527_v11 }
 0xf21   :  { %4529 = vmatprep.subr.bf16.mxu0 %v4973_v16 }
 0xf24   :  { %4531 = vmatpush3.bf16.msra.mxu0 %v4530_v1 }
 0xf25   :  { %4532 = vmatprep.subr.bf16.mxu0 %v4973_v16 }
 0xf28   :  { %4534 = vmatpush3.bf16.msra.mxu0 %v4533_v34 }
 0xf29   :  { %4535 = vmatprep.subr.bf16.mxu0 %v4973_v16 }
 0xf2c   :  { %4537 = vmatpush3.bf16.msra.mxu0 %v4536_v10 }
 0xf2d   :  { %4538 = vmatprep.subr.bf16.mxu0 %v4973_v16 }
 0xf30   :  { %4540 = vmatpush3.bf16.msra.mxu0 %v4539_v24 }
 0xf31   :  { %4541 = vmatprep.subr.bf16.mxu0 %v4973_v16 }
 0xf34   :  { %4543 = vmatpush3.bf16.msra.mxu0 %v4542_v46 }
 0xfea   :  { %v3192_v2 = vpop.f32.mrb[30].mxu0  ;;  %v3263_v49 = vpop.f32.mrb[38].mxu1 }
 0xfeb   :  { %v3268_v62 = vadd.f32 %v3192_v2, %v337_v50  ;;  %v3194_v61 = vpop.f32.mrb[31].mxu0  ;;  %v3265_v0 = vpop.f32.mrb[39].mxu1  ;;  %v4616_v30 = vadd.f32 %v3263_v49, %v5354_v54  ;;  %v3435_v54 = vld [vmem:[%s5980_s5] ss:$0 sm:$0xff] }
 0xfec   :  { %v3269_v37 = vadd.f32 %v3194_v61, %v339_v22  ;;  %v4617_v25 = vadd.f32 %v3265_v0, %v5351_v63 }
 0xfed   :  { %4836 = vtanh.f32 %v3268_v62 }
 0xfee   :  { %4838 = vtanh.f32 %v3269_v37 }
 0xfef   :  { %4840 = vtanh.f32 %v4617_v25 }
 0xff0   :  { %4842 = vtanh.f32 %v4616_v30 }
 0xff7   :  { %v4837_v31 = vpop.eup %4836 }
 0xff8   :  { %v3275_v38 = vmul.f32 0.5, %v4837_v31  ;;  %v4839_v39 = vpop.eup %4838 }
 0xff9   :  { %v3276_v53 = vmul.f32 0.5, %v4839_v39  ;;  %v4841_v33 = vpop.eup %4840 }
 0xffa   :  { %v3278_v32 = vadd.f32 0.5, %v3275_v38  ;;  %v4843_v56 = vpop.eup %4842 }
 0xffb   :  { %v3279_v52 = vadd.f32 0.5, %v3276_v53  ;;  %v3277_v59 = vmul.f32 0.5, %v4843_v56 }
 0xffc   :  { %v3283_v48 = vmul.f32 %v4841_v33, %v3278_v32 }
 0xffd   :  { %v3282_v51 = vmul.f32 %v3279_v52, %v5949_v42  ;;  %v3280_v63 = vadd.f32 0.5, %v3277_v59 }
 0xfff   :  { %v3284_v55 = vadd.f32 %v3283_v48, %v3282_v51 }
0x1001   :  { %4844 = vtanh.f32 %v3284_v55 }
0x100b   :  { %v4845_v4 = vpop.eup %4844 }
0x100c   :  { %v3286_v5 = vmul.f32 %v4845_v4, %v3280_v63 }
0x100e   :  { %3486 = vmatmul.mubr.f32.vlgmr.msra.gmra.mrb[32].mxu0 %v3286_v5 }
0x10e1   :  { %v3381_v8 = vpop.f32.mrb[32].mxu0 }
0x10e2   :  { %v3382_v9 = vadd.f32 %v3435_v54, %v3381_v8  ;;  %v3487_v18 = vpop.f32.mrb[33].mxu0 }
0x10e4   :  { %3385 = vst [vmem:[#allocation13] sm:$0xff] %v3382_v9 }
0x10e5   :  { %4945 = shalt.err (!%p4942_p8)
}
0x10e6   :  { %s4946_s28 = scalar_lea.hbm %s5981_s6, 128 }
0x10e7   :  { %p4947_p9 = scmp.ne.s32.totalorder %s5981_s6, %s4946_s28  ;;  %p4950_p10 = scmp.lt.u32.totalorder %s4946_s28, %s5981_s6 }
0x10e9   :  { %p4952_p11 = pnand %p4950_p10, %p4947_p9 }
0x10eb   :  { %4955 = shalt.err (!%p4952_p11)
}
0x10ec   :  { %3395 = dma.vmem_to_hbm [thread:$0]  %s3393_s24, 128, %s5981_s6, [#allocation7]  }
0x10ed   :  { %4962 = dma.done.wait [#allocation7], 128  }
0x10ee   :  { %4963 = vsyncadd [#allocation7], 4294967168 }
0x10ef   :  { %3399 = vsyncpa [#allocation6], 1 }
0x10f0   :  { %3400 = vsyncpa [#allocation9], 1 }
0x10f1   :  { %3401 = vsyncpa [#allocation12], 1 }
0x10f2   :  { %3402 = vsyncpa [#allocation7], 1 }

</bundles_post_ra>
